<compile_context>
chip_gen: v7x
topology: tpu7x:2x2x1
jax: 0.10.0
libtpu: 0.0.40
codegen_flags: <defaults>
</compile_context>

<pallas_src>
import math
import functools

import jax
import jax.numpy as jnp
from jax.experimental import pallas as pl
from jax.experimental.pallas import tpu as pltpu

# ----------------- scaled-down hyper-parameters (original: 224/16/768/12x12) -----------------
IMG_SIZE = 16
PATCH = 4
IN_CHANS = 3
EMBED_DIM = 64
NUM_HEADS = 4
HEAD_DIM = EMBED_DIM // NUM_HEADS
MLP_DIM = 128
NUM_LAYERS = 2
NUM_CNN_CLASSES = 10
NUM_CLASSES = 5
CNN_CHANS = 32
N_PATCHES = (IMG_SIZE // PATCH) ** 2
SEQ = N_PATCHES + 1                    # 17 (cls + patches)
SEQ_PAD = 24                           # padded to a multiple of 8 (sublane-aligned blocks)
PATCH_FEAT = IN_CHANS * PATCH * PATCH  # 48
LN_EPS = 1e-6                          # torchvision vit_b_16 LayerNorm eps


# ============================== in-kernel helpers (values, not refs) ==============================

def _ln(x, g, b, eps=LN_EPS):
    mean = jnp.mean(x, axis=-1, keepdims=True)
    xc = x - mean
    var = jnp.mean(xc * xc, axis=-1, keepdims=True)
    return xc * jax.lax.rsqrt(var + eps) * g + b


def _gelu(x):
    # exact (erf) GELU, matching torch.nn.GELU default used by torchvision ViT MLP
    return 0.5 * x * (1.0 + jax.lax.erf(x * (1.0 / math.sqrt(2.0))))


# ============================== the single fused Pallas kernel ==============================

def _fused_forward_kernel(patches_ref, pos_ref,
                          cconv_w, cconv_b, cfc_w, cfc_b, lin_w, lin_b,
                          patch_w, patch_b,
                          ln_ref, wqkv_ref, bqkv_ref, wo_ref, bo_ref,
                          w1_ref, b1_ref, w2_ref, b2_ref,
                          lnf_ref, heads_w, heads_b,
                          o_ref, x_sc, *, scale):
    """Whole forward for one batch element. grid = (B, NUM_LAYERS).

    l == 0               : stem (CNN branch -> cls token, patch embed, pos add) -> VMEM slab
    every l              : one pre-LN transformer block (slab stays VMEM-resident)
    l == NUM_LAYERS - 1  : final LN on the cls row + classification head -> logits row
    """
    l = pl.program_id(1)
    bf16 = jnp.bfloat16

    # ---------------- stem: only on the first layer step of this batch element ----------------
    @pl.when(l == 0)
    def _stem():
        patches = patches_ref[0].astype(bf16)                                 # (nP, C*P*P)
        # TODO(synk): resnext50_32x4d backbone reduced to conv(k=s=4)->ReLU->GAP->FC stand-in.
        feat = jnp.dot(patches, cconv_w[...],
                       preferred_element_type=jnp.float32) + cconv_b[...]
        feat = jnp.maximum(feat, 0.0)                                         # (nP, CNN_CHANS)
        pooled = jnp.mean(feat, axis=0, keepdims=True)                        # global average pool
        cnn_logits = jnp.dot(pooled.astype(bf16), cfc_w[...],
                             preferred_element_type=jnp.float32) + cfc_b[...] # (1, NUM_CNN_CLASSES)
        cls_tok = jnp.dot(cnn_logits.astype(bf16), lin_w[...],
                          preferred_element_type=jnp.float32) + lin_b[...]    # (1, D)
        tokens = jnp.dot(patches, patch_w[...],
                         preferred_element_type=jnp.float32) + patch_b[...]   # (nP, D)
        pad = jnp.zeros((SEQ_PAD - SEQ, EMBED_DIM), jnp.float32)
        # single full-slab store; pos_ref is zero on the pad rows
        x_sc[...] = jnp.concatenate([cls_tok, tokens, pad], axis=0) + pos_ref[...]

    # ---------------- one pre-LN transformer encoder block ----------------
    x = x_sc[...]                                                             # (S_pad, D) f32
    ln = ln_ref[0]                                                            # (4, D): ln1_g, ln1_b, ln2_g, ln2_b
    h1 = _ln(x, ln[0:1, :], ln[1:2, :])

    # slab QKV projection: one (S_pad, D) @ (D, 3D) MXU op for all heads
    qkv = jnp.dot(h1.astype(bf16), wqkv_ref[0],
                  preferred_element_type=jnp.float32) + bqkv_ref[0]           # (S_pad, 3D)

    # mask for padded key columns (positions >= SEQ)
    col = jax.lax.broadcasted_iota(jnp.int32, (SEQ_PAD, SEQ_PAD), 1)
    neg = jnp.where(col < SEQ, 0.0, -1e30).astype(jnp.float32)

    ctx_parts = []
    for h in range(NUM_HEADS):
        q = qkv[:, h * HEAD_DIM:(h + 1) * HEAD_DIM]
        k = qkv[:, EMBED_DIM + h * HEAD_DIM:EMBED_DIM + (h + 1) * HEAD_DIM]
        v = qkv[:, 2 * EMBED_DIM + h * HEAD_DIM:2 * EMBED_DIM + (h + 1) * HEAD_DIM]
        s = jax.lax.dot_general(q.astype(bf16), k.astype(bf16),
                                (((1,), (1,)), ((), ())),
                                preferred_element_type=jnp.float32) * scale + neg
        s = s - jnp.max(s, axis=-1, keepdims=True)
        p = jnp.exp(s)
        p = p * pl.reciprocal(jnp.sum(p, axis=-1, keepdims=True), approx=True)
        ctx_parts.append(jnp.dot(p.astype(bf16), v.astype(bf16),
                                 preferred_element_type=jnp.float32))         # (S_pad, Dh)
    ctx = jnp.concatenate(ctx_parts, axis=-1)                                 # (S_pad, D)

    attn = jnp.dot(ctx.astype(bf16), wo_ref[0],
                   preferred_element_type=jnp.float32) + bo_ref[0]
    x2 = x + attn

    h2 = _ln(x2, ln[2:3, :], ln[3:4, :])
    m = jnp.dot(h2.astype(bf16), w1_ref[0], preferred_element_type=jnp.float32) + b1_ref[0]
    m = _gelu(m)
    m = jnp.dot(m.astype(bf16), w2_ref[0], preferred_element_type=jnp.float32) + b2_ref[0]
    x_sc[...] = x2 + m

    # ---------------- final LN (cls row only; LN is row-wise so this is exact) + head ----------------
    @pl.when(l == pl.num_programs(1) - 1)
    def _head():
        cls = _ln(x_sc[0:1, :], lnf_ref[0:1, :], lnf_ref[1:2, :])             # (1, D)
        o_ref[0] = jnp.dot(cls.astype(bf16), heads_w[...],
                           preferred_element_type=jnp.float32) + heads_b[...]


# ============================== BlockSpec helpers ==============================

def _const_spec(a):
    """Full array, same block every grid step (fetched once, stays VMEM-resident)."""
    zeros = (0,) * a.ndim
    return pl.BlockSpec(a.shape, lambda b, l, _z=zeros: _z)


def _layer_spec(a):
    """Stacked-per-layer weight: leading axis selected by the layer grid index."""
    block = (1,) + tuple(a.shape[1:])
    rest = (0,) * (a.ndim - 1)
    return pl.BlockSpec(block, lambda b, l, _r=rest: (l,) + _r)


# ============================== plain-JAX glue ==============================

def extract_patches(x, p):
    """NCHW image -> (B, n_patches, C*p*p) rows (conv k=s=p as im2col)."""
    B, C, H, W = x.shape
    x = x.reshape(B, C, H // p, p, W // p, p)
    x = x.transpose(0, 2, 4, 1, 3, 5)                 # (B, Hp, Wp, C, p, p)
    return x.reshape(B, (H // p) * (W // p), C * p * p)


def sincos_pos_embed(n_positions, dim):
    position = jnp.arange(n_positions, dtype=jnp.float32)[:, None]
    div_term = jnp.exp(jnp.arange(0, dim, 2, dtype=jnp.float32) *
                       (-math.log(10000.0) / dim))
    pe = jnp.zeros((n_positions, dim), dtype=jnp.float32)
    pe = pe.at[:, 0::2].set(jnp.sin(position * div_term))
    pe = pe.at[:, 1::2].set(jnp.cos(position * div_term))
    return pe


def init_params(key):
    keys = iter(jax.random.split(key, 64))

    def nrm(shape, scale=0.02):
        return scale * jax.random.normal(next(keys), shape, dtype=jnp.float32)

    params = {
        # TODO(synk): resnext50_32x4d backbone reduced to conv(k=s=4)->ReLU->GAP->FC stand-in.
        "cnn_conv_w": nrm((PATCH_FEAT, CNN_CHANS)),
        "cnn_conv_b": nrm((1, CNN_CHANS)),
        "cnn_fc_w": nrm((CNN_CHANS, NUM_CNN_CLASSES)),
        "cnn_fc_b": nrm((1, NUM_CNN_CLASSES)),
        "linear_w": nrm((NUM_CNN_CLASSES, EMBED_DIM)),      # linear_layer: cnn logits -> cls token
        "linear_b": nrm((1, EMBED_DIM)),
        "patch_w": nrm((PATCH_FEAT, EMBED_DIM)),            # PatchEmbedding.proj
        "patch_b": nrm((1, EMBED_DIM)),
        "enc_pos_embed": nrm((SEQ, EMBED_DIM)),             # torchvision Encoder's learned pos emb
        "heads_w": nrm((EMBED_DIM, NUM_CLASSES)),           # vit.heads
        "heads_b": nrm((1, NUM_CLASSES)),
        "ln_f_g": jnp.ones((1, EMBED_DIM), jnp.float32),
        "ln_f_b": jnp.zeros((1, EMBED_DIM), jnp.float32),
        "layers": [],
    }
    for _ in range(NUM_LAYERS):
        params["layers"].append({
            "ln1_g": jnp.ones((1, EMBED_DIM), jnp.float32),
            "ln1_b": jnp.zeros((1, EMBED_DIM), jnp.float32),
            "wq": nrm((EMBED_DIM, EMBED_DIM)),
            "wk": nrm((EMBED_DIM, EMBED_DIM)),
            "wv": nrm((EMBED_DIM, EMBED_DIM)),
            "bq": nrm((1, EMBED_DIM)),
            "bk": nrm((1, EMBED_DIM)),
            "bv": nrm((1, EMBED_DIM)),
            "wo": nrm((EMBED_DIM, EMBED_DIM)),
            "bo": nrm((1, EMBED_DIM)),
            "ln2_g": jnp.ones((1, EMBED_DIM), jnp.float32),
            "ln2_b": jnp.zeros((1, EMBED_DIM), jnp.float32),
            "mlp_w1": nrm((EMBED_DIM, MLP_DIM)),
            "mlp_b1": nrm((1, MLP_DIM)),
            "mlp_w2": nrm((MLP_DIM, EMBED_DIM)),
            "mlp_b2": nrm((1, EMBED_DIM)),
        })
    return params


def cnn_vit_forward(params, x):
    B = x.shape[0]
    D = EMBED_DIM
    bf16 = jnp.bfloat16

    # im2col patch extraction (plain-JAX glue at the boundary; conv k=s=PATCH)
    patches = extract_patches(x, PATCH)                                        # (B, nP, C*P*P)

    # fixed sincos pos-embed + learned encoder pos-embed, padded with zeros to SEQ_PAD rows
    pos = sincos_pos_embed(SEQ, D) + params["enc_pos_embed"]
    pos = jnp.concatenate([pos, jnp.zeros((SEQ_PAD - SEQ, D), jnp.float32)], axis=0)

    # stack per-layer weights along a leading layer axis; MXU operands stored in bf16
    layers = params["layers"]
    ln_params = jnp.stack([jnp.concatenate(
        [lp["ln1_g"], lp["ln1_b"], lp["ln2_g"], lp["ln2_b"]], axis=0) for lp in layers])   # (L,4,D)
    wqkv = jnp.stack([jnp.concatenate([lp["wq"], lp["wk"], lp["wv"]], axis=1)
                      for lp in layers]).astype(bf16)                                      # (L,D,3D)
    bqkv = jnp.stack([jnp.concatenate([lp["bq"], lp["bk"], lp["bv"]], axis=1)
                      for lp in layers])                                                   # (L,1,3D)
    wo = jnp.stack([lp["wo"] for lp in layers]).astype(bf16)                               # (L,D,D)
    bo = jnp.stack([lp["bo"] for lp in layers])                                            # (L,1,D)
    w1 = jnp.stack([lp["mlp_w1"] for lp in layers]).astype(bf16)                           # (L,D,MLP)
    b1 = jnp.stack([lp["mlp_b1"] for lp in layers])                                        # (L,1,MLP)
    w2 = jnp.stack([lp["mlp_w2"] for lp in layers]).astype(bf16)                           # (L,MLP,D)
    b2 = jnp.stack([lp["mlp_b2"] for lp in layers])                                        # (L,1,D)
    lnf = jnp.concatenate([params["ln_f_g"], params["ln_f_b"]], axis=0)                    # (2,D)

    args = (
        patches, pos,
        params["cnn_conv_w"].astype(bf16), params["cnn_conv_b"],
        params["cnn_fc_w"].astype(bf16), params["cnn_fc_b"],
        params["linear_w"].astype(bf16), params["linear_b"],
        params["patch_w"].astype(bf16), params["patch_b"],
        ln_params, wqkv, bqkv, wo, bo, w1, b1, w2, b2,
        lnf, params["heads_w"].astype(bf16), params["heads_b"],
    )

    in_specs = [pl.BlockSpec((1, N_PATCHES, PATCH_FEAT), lambda b, l: (b, 0, 0)),  # per-batch patches
                _const_spec(pos)]
    in_specs += [_const_spec(a) for a in args[2:10]]        # stem weights (fetched once)
    in_specs += [_layer_spec(a) for a in args[10:19]]       # stacked per-layer weights (double-buffered)
    in_specs += [_const_spec(a) for a in args[19:22]]       # final LN + head weights

    # rough flop/byte estimate so XLA can schedule surrounding ops around the fused call
    flops_layer = 2 * SEQ_PAD * (D * 3 * D + 2 * NUM_HEADS * SEQ_PAD * HEAD_DIM
                                 + D * D + 2 * D * MLP_DIM)
    flops = B * (NUM_LAYERS * flops_layer
                 + 2 * N_PATCHES * PATCH_FEAT * (CNN_CHANS + D)
                 + 2 * D * NUM_CLASSES)
    transcendentals = B * NUM_LAYERS * (NUM_HEADS * SEQ_PAD * SEQ_PAD + SEQ_PAD * MLP_DIM)
    bytes_accessed = int(sum(a.size * a.dtype.itemsize for a in args)) + B * NUM_CLASSES * 4

    kernel = functools.partial(_fused_forward_kernel, scale=1.0 / math.sqrt(HEAD_DIM))
    logits = pl.pallas_call(
        kernel,
        grid=(B, NUM_LAYERS),
        in_specs=in_specs,
        out_specs=pl.BlockSpec((1, 1, NUM_CLASSES), lambda b, l: (b, 0, 0)),
        out_shape=jax.ShapeDtypeStruct((B, 1, NUM_CLASSES), jnp.float32),
        scratch_shapes=[pltpu.VMEM((SEQ_PAD, EMBED_DIM), jnp.float32)],
        compiler_params=pltpu.CompilerParams(
            dimension_semantics=("parallel", "arbitrary")),
        cost_estimate=pl.CostEstimate(flops=flops, transcendentals=transcendentals,
                                      bytes_accessed=bytes_accessed),
    )(*args)
    return logits[:, 0, :]


if __name__ == "__main__":
    key = jax.random.PRNGKey(0)
    pkey, xkey = jax.random.split(key)
    params = init_params(pkey)
    x = jax.random.normal(xkey, (2, IN_CHANS, IMG_SIZE, IMG_SIZE), dtype=jnp.float32)

    logits = jax.jit(cnn_vit_forward)(params, x)
    jax.block_until_ready(logits)
    assert logits.shape == (2, NUM_CLASSES)
    assert bool(jnp.all(jnp.isfinite(logits)))
    print("KERNEL_OK")
</pallas_src>

<mosaic_0001>
module attributes {stable_mosaic.version = 11 : i64} {
  func.func @_fused_forward_kernel(%arg0: i32, %arg1: i32, %arg2: memref<1x16x48xf32, #tpu.memory_space<vmem>>, %arg3: memref<24x64xf32, #tpu.memory_space<vmem>>, %arg4: memref<48x32xbf16, #tpu.memory_space<vmem>>, %arg5: memref<1x32xf32, #tpu.memory_space<vmem>>, %arg6: memref<32x10xbf16, #tpu.memory_space<vmem>>, %arg7: memref<1x10xf32, #tpu.memory_space<vmem>>, %arg8: memref<10x64xbf16, #tpu.memory_space<vmem>>, %arg9: memref<1x64xf32, #tpu.memory_space<vmem>>, %arg10: memref<48x64xbf16, #tpu.memory_space<vmem>>, %arg11: memref<1x64xf32, #tpu.memory_space<vmem>>, %arg12: memref<1x4x64xf32, #tpu.memory_space<vmem>>, %arg13: memref<1x64x192xbf16, #tpu.memory_space<vmem>>, %arg14: memref<1x1x192xf32, #tpu.memory_space<vmem>>, %arg15: memref<1x64x64xbf16, #tpu.memory_space<vmem>>, %arg16: memref<1x1x64xf32, #tpu.memory_space<vmem>>, %arg17: memref<1x64x128xbf16, #tpu.memory_space<vmem>>, %arg18: memref<1x1x128xf32, #tpu.memory_space<vmem>>, %arg19: memref<1x128x64xbf16, #tpu.memory_space<vmem>>, %arg20: memref<1x1x64xf32, #tpu.memory_space<vmem>>, %arg21: memref<2x64xf32, #tpu.memory_space<vmem>>, %arg22: memref<64x5xbf16, #tpu.memory_space<vmem>>, %arg23: memref<1x5xf32, #tpu.memory_space<vmem>>, %arg24: memref<1x1x5xf32, #tpu.memory_space<vmem>>, %arg25: memref<24x64xf32, #tpu.memory_space<vmem>>) attributes {dimension_semantics = [#tpu.dimension_semantics<parallel>, #tpu.dimension_semantics<arbitrary>], iteration_bounds = array<i64: 2, 2>, scalar_prefetch = 0 : i64, scratch_operands = 1 : i64, tpu.core_type = #tpu.core_type<tc>, window_params = [{transform_indices = @transform_0, window_bounds = array<i64: 1, 16, 48>}, {pipeline_mode = #tpu.pipeline_mode<synchronous>, transform_indices = @transform_1, window_bounds = array<i64: 24, 64>}, {pipeline_mode = #tpu.pipeline_mode<synchronous>, transform_indices = @transform_2, window_bounds = array<i64: 48, 32>}, {pipeline_mode = #tpu.pipeline_mode<synchronous>, transform_indices = @transform_3, window_bounds = array<i64: 1, 32>}, {pipeline_mode = #tpu.pipeline_mode<synchronous>, transform_indices = @transform_4, window_bounds = array<i64: 32, 10>}, {pipeline_mode = #tpu.pipeline_mode<synchronous>, transform_indices = @transform_5, window_bounds = array<i64: 1, 10>}, {pipeline_mode = #tpu.pipeline_mode<synchronous>, transform_indices = @transform_6, window_bounds = array<i64: 10, 64>}, {pipeline_mode = #tpu.pipeline_mode<synchronous>, transform_indices = @transform_7, window_bounds = array<i64: 1, 64>}, {pipeline_mode = #tpu.pipeline_mode<synchronous>, transform_indices = @transform_8, window_bounds = array<i64: 48, 64>}, {pipeline_mode = #tpu.pipeline_mode<synchronous>, transform_indices = @transform_9, window_bounds = array<i64: 1, 64>}, {transform_indices = @transform_10, window_bounds = array<i64: 1, 4, 64>}, {transform_indices = @transform_11, window_bounds = array<i64: 1, 64, 192>}, {transform_indices = @transform_12, window_bounds = array<i64: 1, 1, 192>}, {transform_indices = @transform_13, window_bounds = array<i64: 1, 64, 64>}, {transform_indices = @transform_14, window_bounds = array<i64: 1, 1, 64>}, {transform_indices = @transform_15, window_bounds = array<i64: 1, 64, 128>}, {transform_indices = @transform_16, window_bounds = array<i64: 1, 1, 128>}, {transform_indices = @transform_17, window_bounds = array<i64: 1, 128, 64>}, {transform_indices = @transform_18, window_bounds = array<i64: 1, 1, 64>}, {pipeline_mode = #tpu.pipeline_mode<synchronous>, transform_indices = @transform_19, window_bounds = array<i64: 2, 64>}, {pipeline_mode = #tpu.pipeline_mode<synchronous>, transform_indices = @transform_20, window_bounds = array<i64: 64, 5>}, {pipeline_mode = #tpu.pipeline_mode<synchronous>, transform_indices = @transform_21, window_bounds = array<i64: 1, 5>}, {transform_indices = @transform_22, window_bounds = array<i64: 1, 1, 5>}]} {
    %c0_i32 = arith.constant 0 : i32
    %0 = arith.cmpi eq, %arg1, %c0_i32 : i32
    %1 = arith.extui %0 : i1 to i32
    %c0_i32_0 = arith.constant 0 : i32
    %2 = arith.cmpi ne, %1, %c0_i32_0 : i32
    scf.if %2 {
      %c0_70 = arith.constant 0 : index
      %c0_71 = arith.constant 0 : index
      %c0_72 = arith.constant 0 : index
      %191 = vector.load %arg2[%c0_70, %c0_71, %c0_72] : memref<1x16x48xf32, #tpu.memory_space<vmem>>, vector<1x16x48xf32>
      %192 = vector.shape_cast %191 : vector<1x16x48xf32> to vector<16x48xf32>
      %193 = arith.truncf %192 : vector<16x48xf32> to vector<16x48xbf16>
      %c0_73 = arith.constant 0 : index
      %c0_74 = arith.constant 0 : index
      %194 = vector.load %arg4[%c0_73, %c0_74] : memref<48x32xbf16, #tpu.memory_space<vmem>>, vector<48x32xbf16>
      %cst_75 = arith.constant dense<0.000000e+00> : vector<16x32xf32>
      %195 = tpu.matmul %193, %194, %cst_75 {dimension_numbers = #tpu.dot_dimension_numbers<[1], [0], [0], [1], [0, 0, 1, 1], [], []>} : vector<16x48xbf16>, vector<48x32xbf16>, vector<16x32xf32> -> vector<16x32xf32>
      %c0_76 = arith.constant 0 : index
      %c0_77 = arith.constant 0 : index
      %196 = vector.load %arg5[%c0_76, %c0_77] : memref<1x32xf32, #tpu.memory_space<vmem>>, vector<1x32xf32>
      %197 = vector.broadcast %196 : vector<1x32xf32> to vector<16x32xf32>
      %198 = arith.addf %195, %197 : vector<16x32xf32>
      %cst_78 = arith.constant 0.000000e+00 : f32
      %199 = vector.broadcast %cst_78 : f32 to vector<16x32xf32>
      %200 = arith.maximumf %198, %199 : vector<16x32xf32>
      %cst_79 = arith.constant dense<0.000000e+00> : vector<32xf32>
      %201 = vector.multi_reduction <add>, %200, %cst_79 [0] : vector<16x32xf32> to vector<32xf32>
      %202 = vector.shape_cast %201 : vector<32xf32> to vector<1x32xf32>
      %cst_80 = arith.constant 1.600000e+01 : f32
      %203 = vector.broadcast %cst_80 : f32 to vector<1x32xf32>
      %204 = arith.divf %202, %203 : vector<1x32xf32>
      %205 = arith.truncf %204 : vector<1x32xf32> to vector<1x32xbf16>
      %c0_81 = arith.constant 0 : index
      %c0_82 = arith.constant 0 : index
      %206 = vector.load %arg6[%c0_81, %c0_82] : memref<32x10xbf16, #tpu.memory_space<vmem>>, vector<32x10xbf16>
      %cst_83 = arith.constant dense<0.000000e+00> : vector<1x10xf32>
      %207 = tpu.matmul %205, %206, %cst_83 {dimension_numbers = #tpu.dot_dimension_numbers<[1], [0], [0], [1], [0, 0, 1, 1], [], []>} : vector<1x32xbf16>, vector<32x10xbf16>, vector<1x10xf32> -> vector<1x10xf32>
      %c0_84 = arith.constant 0 : index
      %c0_85 = arith.constant 0 : index
      %208 = vector.load %arg7[%c0_84, %c0_85] : memref<1x10xf32, #tpu.memory_space<vmem>>, vector<1x10xf32>
      %209 = arith.addf %207, %208 : vector<1x10xf32>
      %210 = arith.truncf %209 : vector<1x10xf32> to vector<1x10xbf16>
      %c0_86 = arith.constant 0 : index
      %c0_87 = arith.constant 0 : index
      %211 = vector.load %arg8[%c0_86, %c0_87] : memref<10x64xbf16, #tpu.memory_space<vmem>>, vector<10x64xbf16>
      %cst_88 = arith.constant dense<0.000000e+00> : vector<1x64xf32>
      %212 = tpu.matmul %210, %211, %cst_88 {dimension_numbers = #tpu.dot_dimension_numbers<[1], [0], [0], [1], [0, 0, 1, 1], [], []>} : vector<1x10xbf16>, vector<10x64xbf16>, vector<1x64xf32> -> vector<1x64xf32>
      %c0_89 = arith.constant 0 : index
      %c0_90 = arith.constant 0 : index
      %213 = vector.load %arg9[%c0_89, %c0_90] : memref<1x64xf32, #tpu.memory_space<vmem>>, vector<1x64xf32>
      %214 = arith.addf %212, %213 : vector<1x64xf32>
      %c0_91 = arith.constant 0 : index
      %c0_92 = arith.constant 0 : index
      %215 = vector.load %arg10[%c0_91, %c0_92] : memref<48x64xbf16, #tpu.memory_space<vmem>>, vector<48x64xbf16>
      %cst_93 = arith.constant dense<0.000000e+00> : vector<16x64xf32>
      %216 = tpu.matmul %193, %215, %cst_93 {dimension_numbers = #tpu.dot_dimension_numbers<[1], [0], [0], [1], [0, 0, 1, 1], [], []>} : vector<16x48xbf16>, vector<48x64xbf16>, vector<16x64xf32> -> vector<16x64xf32>
      %c0_94 = arith.constant 0 : index
      %c0_95 = arith.constant 0 : index
      %217 = vector.load %arg11[%c0_94, %c0_95] : memref<1x64xf32, #tpu.memory_space<vmem>>, vector<1x64xf32>
      %218 = vector.broadcast %217 : vector<1x64xf32> to vector<16x64xf32>
      %219 = arith.addf %216, %218 : vector<16x64xf32>
      %cst_96 = arith.constant 0.000000e+00 : f32
      %220 = vector.broadcast %cst_96 : f32 to vector<7x64xf32>
      %221 = tpu.concatenate %214, %219, %220 in 0 : vector<1x64xf32>, vector<16x64xf32>, vector<7x64xf32> -> vector<24x64xf32>
      %c0_97 = arith.constant 0 : index
      %c0_98 = arith.constant 0 : index
      %222 = vector.load %arg3[%c0_97, %c0_98] : memref<24x64xf32, #tpu.memory_space<vmem>>, vector<24x64xf32>
      %223 = arith.addf %221, %222 : vector<24x64xf32>
      %c0_99 = arith.constant 0 : index
      %c0_100 = arith.constant 0 : index
      %224 = vector.load %arg25[%c0_99, %c0_100] : memref<24x64xf32, #tpu.memory_space<vmem>>, vector<24x64xf32>
      tpu.vector_store %arg25[%c0_99, %c0_100], %223 {strides = array<i32>} : memref<24x64xf32, #tpu.memory_space<vmem>>, vector<24x64xf32>,
    } else {
    }
    %c0 = arith.constant 0 : index
    %c0_1 = arith.constant 0 : index
    %3 = vector.load %arg25[%c0, %c0_1] : memref<24x64xf32, #tpu.memory_space<vmem>>, vector<24x64xf32>
    %c0_2 = arith.constant 0 : index
    %c0_3 = arith.constant 0 : index
    %c0_4 = arith.constant 0 : index
    %4 = vector.load %arg12[%c0_2, %c0_3, %c0_4] : memref<1x4x64xf32, #tpu.memory_space<vmem>>, vector<1x4x64xf32>
    %5 = vector.shape_cast %4 : vector<1x4x64xf32> to vector<4x64xf32>
    %6 = vector.extract_strided_slice %5 {offsets = [0, 0], sizes = [1, 64], strides = [1, 1]} : vector<4x64xf32> to vector<1x64xf32>
    %7 = vector.extract_strided_slice %5 {offsets = [1, 0], sizes = [1, 64], strides = [1, 1]} : vector<4x64xf32> to vector<1x64xf32>
    %cst = arith.constant dense<0.000000e+00> : vector<24xf32>
    %8 = vector.multi_reduction <add>, %3, %cst [1] : vector<24x64xf32> to vector<24xf32>
    %9 = vector.shape_cast %8 : vector<24xf32> to vector<24x1xf32>
    %cst_5 = arith.constant 6.400000e+01 : f32
    %10 = vector.broadcast %cst_5 : f32 to vector<24x1xf32>
    %11 = arith.divf %9, %10 : vector<24x1xf32>
    %12 = vector.broadcast %11 : vector<24x1xf32> to vector<24x64xf32>
    %13 = arith.subf %3, %12 : vector<24x64xf32>
    %14 = arith.mulf %13, %13 : vector<24x64xf32>
    %cst_6 = arith.constant dense<0.000000e+00> : vector<24xf32>
    %15 = vector.multi_reduction <add>, %14, %cst_6 [1] : vector<24x64xf32> to vector<24xf32>
    %16 = vector.shape_cast %15 : vector<24xf32> to vector<24x1xf32>
    %cst_7 = arith.constant 6.400000e+01 : f32
    %17 = vector.broadcast %cst_7 : f32 to vector<24x1xf32>
    %18 = arith.divf %16, %17 : vector<24x1xf32>
    %cst_8 = arith.constant 9.99999997E-7 : f32
    %19 = vector.broadcast %cst_8 : f32 to vector<24x1xf32>
    %20 = arith.addf %18, %19 : vector<24x1xf32>
    %21 = math.rsqrt %20 : vector<24x1xf32>
    %22 = vector.broadcast %21 : vector<24x1xf32> to vector<24x64xf32>
    %23 = arith.mulf %13, %22 : vector<24x64xf32>
    %24 = vector.broadcast %6 : vector<1x64xf32> to vector<24x64xf32>
    %25 = arith.mulf %23, %24 : vector<24x64xf32>
    %26 = vector.broadcast %7 : vector<1x64xf32> to vector<24x64xf32>
    %27 = arith.addf %25, %26 : vector<24x64xf32>
    %28 = arith.truncf %27 : vector<24x64xf32> to vector<24x64xbf16>
    %c0_9 = arith.constant 0 : index
    %c0_10 = arith.constant 0 : index
    %c0_11 = arith.constant 0 : index
    %29 = vector.load %arg13[%c0_9, %c0_10, %c0_11] : memref<1x64x192xbf16, #tpu.memory_space<vmem>>, vector<1x64x192xbf16>
    %30 = vector.shape_cast %29 : vector<1x64x192xbf16> to vector<64x192xbf16>
    %cst_12 = arith.constant dense<0.000000e+00> : vector<24x192xf32>
    %31 = tpu.matmul %28, %30, %cst_12 {dimension_numbers = #tpu.dot_dimension_numbers<[1], [0], [0], [1], [0, 0, 1, 1], [], []>} : vector<24x64xbf16>, vector<64x192xbf16>, vector<24x192xf32> -> vector<24x192xf32>
    %c0_13 = arith.constant 0 : index
    %c0_14 = arith.constant 0 : index
    %c0_15 = arith.constant 0 : index
    %32 = vector.load %arg14[%c0_13, %c0_14, %c0_15] : memref<1x1x192xf32, #tpu.memory_space<vmem>>, vector<1x1x192xf32>
    %33 = vector.shape_cast %32 : vector<1x1x192xf32> to vector<1x192xf32>
    %34 = vector.broadcast %33 : vector<1x192xf32> to vector<24x192xf32>
    %35 = arith.addf %31, %34 : vector<24x192xf32>
    %36 = tpu.iota {dimensions = array<i32: 1>} : vector<24x24xi32>
    %c17_i32 = arith.constant 17 : i32
    %37 = vector.broadcast %c17_i32 : i32 to vector<24x24xi32>
    %38 = arith.cmpi slt, %36, %37 : vector<24x24xi32>
    %cst_16 = arith.constant 0.000000e+00 : f32
    %cst_17 = arith.constant -1.000000e+30 : f32
    %39 = vector.broadcast %cst_16 : f32 to vector<24x24xf32>
    %40 = vector.broadcast %cst_17 : f32 to vector<24x24xf32>
    %41 = arith.select %38, %39, %40 : vector<24x24xi1>, vector<24x24xf32>
    %42 = vector.extract_strided_slice %35 {offsets = [0, 0], sizes = [24, 16], strides = [1, 1]} : vector<24x192xf32> to vector<24x16xf32>
    %43 = vector.extract_strided_slice %35 {offsets = [0, 64], sizes = [24, 16], strides = [1, 1]} : vector<24x192xf32> to vector<24x16xf32>
    %44 = vector.extract_strided_slice %35 {offsets = [0, 128], sizes = [24, 16], strides = [1, 1]} : vector<24x192xf32> to vector<24x16xf32>
    %45 = arith.truncf %42 : vector<24x16xf32> to vector<24x16xbf16>
    %46 = arith.truncf %43 : vector<24x16xf32> to vector<24x16xbf16>
    %cst_18 = arith.constant dense<0.000000e+00> : vector<24x24xf32>
    %47 = tpu.matmul %45, %46, %cst_18 {dimension_numbers = #tpu.dot_dimension_numbers<[1], [1], [0], [0], [0, 0, 1, 0], [], []>} : vector<24x16xbf16>, vector<24x16xbf16>, vector<24x24xf32> -> vector<24x24xf32>
    %cst_19 = arith.constant 2.500000e-01 : f32
    %48 = vector.broadcast %cst_19 : f32 to vector<24x24xf32>
    %49 = arith.mulf %47, %48 : vector<24x24xf32>
    %50 = arith.addf %49, %41 : vector<24x24xf32>
    %cst_20 = arith.constant dense<0xFF800000> : vector<24xf32>
    %51 = vector.multi_reduction <maximumf>, %50, %cst_20 [1] : vector<24x24xf32> to vector<24xf32>
    %52 = vector.shape_cast %51 : vector<24xf32> to vector<24x1xf32>
    %53 = vector.broadcast %52 : vector<24x1xf32> to vector<24x24xf32>
    %54 = arith.subf %50, %53 : vector<24x24xf32>
    %55 = math.exp %54 : vector<24x24xf32>
    %cst_21 = arith.constant dense<0.000000e+00> : vector<24xf32>
    %56 = vector.multi_reduction <add>, %55, %cst_21 [1] : vector<24x24xf32> to vector<24xf32>
    %57 = vector.shape_cast %56 : vector<24xf32> to vector<24x1xf32>
    %58 = tpu.reciprocal %57 {approx = true} : vector<24x1xf32> -> vector<24x1xf32>
    %59 = vector.broadcast %58 : vector<24x1xf32> to vector<24x24xf32>
    %60 = arith.mulf %55, %59 : vector<24x24xf32>
    %61 = arith.truncf %60 : vector<24x24xf32> to vector<24x24xbf16>
    %62 = arith.truncf %44 : vector<24x16xf32> to vector<24x16xbf16>
    %cst_22 = arith.constant dense<0.000000e+00> : vector<24x16xf32>
    %63 = tpu.matmul %61, %62, %cst_22 {dimension_numbers = #tpu.dot_dimension_numbers<[1], [0], [0], [1], [0, 0, 1, 1], [], []>} : vector<24x24xbf16>, vector<24x16xbf16>, vector<24x16xf32> -> vector<24x16xf32>
    %64 = vector.extract_strided_slice %35 {offsets = [0, 16], sizes = [24, 16], strides = [1, 1]} : vector<24x192xf32> to vector<24x16xf32>
    %65 = vector.extract_strided_slice %35 {offsets = [0, 80], sizes = [24, 16], strides = [1, 1]} : vector<24x192xf32> to vector<24x16xf32>
    %66 = vector.extract_strided_slice %35 {offsets = [0, 144], sizes = [24, 16], strides = [1, 1]} : vector<24x192xf32> to vector<24x16xf32>
    %67 = arith.truncf %64 : vector<24x16xf32> to vector<24x16xbf16>
    %68 = arith.truncf %65 : vector<24x16xf32> to vector<24x16xbf16>
    %cst_23 = arith.constant dense<0.000000e+00> : vector<24x24xf32>
    %69 = tpu.matmul %67, %68, %cst_23 {dimension_numbers = #tpu.dot_dimension_numbers<[1], [1], [0], [0], [0, 0, 1, 0], [], []>} : vector<24x16xbf16>, vector<24x16xbf16>, vector<24x24xf32> -> vector<24x24xf32>
    %cst_24 = arith.constant 2.500000e-01 : f32
    %70 = vector.broadcast %cst_24 : f32 to vector<24x24xf32>
    %71 = arith.mulf %69, %70 : vector<24x24xf32>
    %72 = arith.addf %71, %41 : vector<24x24xf32>
    %cst_25 = arith.constant dense<0xFF800000> : vector<24xf32>
    %73 = vector.multi_reduction <maximumf>, %72, %cst_25 [1] : vector<24x24xf32> to vector<24xf32>
    %74 = vector.shape_cast %73 : vector<24xf32> to vector<24x1xf32>
    %75 = vector.broadcast %74 : vector<24x1xf32> to vector<24x24xf32>
    %76 = arith.subf %72, %75 : vector<24x24xf32>
    %77 = math.exp %76 : vector<24x24xf32>
    %cst_26 = arith.constant dense<0.000000e+00> : vector<24xf32>
    %78 = vector.multi_reduction <add>, %77, %cst_26 [1] : vector<24x24xf32> to vector<24xf32>
    %79 = vector.shape_cast %78 : vector<24xf32> to vector<24x1xf32>
    %80 = tpu.reciprocal %79 {approx = true} : vector<24x1xf32> -> vector<24x1xf32>
    %81 = vector.broadcast %80 : vector<24x1xf32> to vector<24x24xf32>
    %82 = arith.mulf %77, %81 : vector<24x24xf32>
    %83 = arith.truncf %82 : vector<24x24xf32> to vector<24x24xbf16>
    %84 = arith.truncf %66 : vector<24x16xf32> to vector<24x16xbf16>
    %cst_27 = arith.constant dense<0.000000e+00> : vector<24x16xf32>
    %85 = tpu.matmul %83, %84, %cst_27 {dimension_numbers = #tpu.dot_dimension_numbers<[1], [0], [0], [1], [0, 0, 1, 1], [], []>} : vector<24x24xbf16>, vector<24x16xbf16>, vector<24x16xf32> -> vector<24x16xf32>
    %86 = vector.extract_strided_slice %35 {offsets = [0, 32], sizes = [24, 16], strides = [1, 1]} : vector<24x192xf32> to vector<24x16xf32>
    %87 = vector.extract_strided_slice %35 {offsets = [0, 96], sizes = [24, 16], strides = [1, 1]} : vector<24x192xf32> to vector<24x16xf32>
    %88 = vector.extract_strided_slice %35 {offsets = [0, 160], sizes = [24, 16], strides = [1, 1]} : vector<24x192xf32> to vector<24x16xf32>
    %89 = arith.truncf %86 : vector<24x16xf32> to vector<24x16xbf16>
    %90 = arith.truncf %87 : vector<24x16xf32> to vector<24x16xbf16>
    %cst_28 = arith.constant dense<0.000000e+00> : vector<24x24xf32>
    %91 = tpu.matmul %89, %90, %cst_28 {dimension_numbers = #tpu.dot_dimension_numbers<[1], [1], [0], [0], [0, 0, 1, 0], [], []>} : vector<24x16xbf16>, vector<24x16xbf16>, vector<24x24xf32> -> vector<24x24xf32>
    %cst_29 = arith.constant 2.500000e-01 : f32
    %92 = vector.broadcast %cst_29 : f32 to vector<24x24xf32>
    %93 = arith.mulf %91, %92 : vector<24x24xf32>
    %94 = arith.addf %93, %41 : vector<24x24xf32>
    %cst_30 = arith.constant dense<0xFF800000> : vector<24xf32>
    %95 = vector.multi_reduction <maximumf>, %94, %cst_30 [1] : vector<24x24xf32> to vector<24xf32>
    %96 = vector.shape_cast %95 : vector<24xf32> to vector<24x1xf32>
    %97 = vector.broadcast %96 : vector<24x1xf32> to vector<24x24xf32>
    %98 = arith.subf %94, %97 : vector<24x24xf32>
    %99 = math.exp %98 : vector<24x24xf32>
    %cst_31 = arith.constant dense<0.000000e+00> : vector<24xf32>
    %100 = vector.multi_reduction <add>, %99, %cst_31 [1] : vector<24x24xf32> to vector<24xf32>
    %101 = vector.shape_cast %100 : vector<24xf32> to vector<24x1xf32>
    %102 = tpu.reciprocal %101 {approx = true} : vector<24x1xf32> -> vector<24x1xf32>
    %103 = vector.broadcast %102 : vector<24x1xf32> to vector<24x24xf32>
    %104 = arith.mulf %99, %103 : vector<24x24xf32>
    %105 = arith.truncf %104 : vector<24x24xf32> to vector<24x24xbf16>
    %106 = arith.truncf %88 : vector<24x16xf32> to vector<24x16xbf16>
    %cst_32 = arith.constant dense<0.000000e+00> : vector<24x16xf32>
    %107 = tpu.matmul %105, %106, %cst_32 {dimension_numbers = #tpu.dot_dimension_numbers<[1], [0], [0], [1], [0, 0, 1, 1], [], []>} : vector<24x24xbf16>, vector<24x16xbf16>, vector<24x16xf32> -> vector<24x16xf32>
    %108 = vector.extract_strided_slice %35 {offsets = [0, 48], sizes = [24, 16], strides = [1, 1]} : vector<24x192xf32> to vector<24x16xf32>
    %109 = vector.extract_strided_slice %35 {offsets = [0, 112], sizes = [24, 16], strides = [1, 1]} : vector<24x192xf32> to vector<24x16xf32>
    %110 = vector.extract_strided_slice %35 {offsets = [0, 176], sizes = [24, 16], strides = [1, 1]} : vector<24x192xf32> to vector<24x16xf32>
    %111 = arith.truncf %108 : vector<24x16xf32> to vector<24x16xbf16>
    %112 = arith.truncf %109 : vector<24x16xf32> to vector<24x16xbf16>
    %cst_33 = arith.constant dense<0.000000e+00> : vector<24x24xf32>
    %113 = tpu.matmul %111, %112, %cst_33 {dimension_numbers = #tpu.dot_dimension_numbers<[1], [1], [0], [0], [0, 0, 1, 0], [], []>} : vector<24x16xbf16>, vector<24x16xbf16>, vector<24x24xf32> -> vector<24x24xf32>
    %cst_34 = arith.constant 2.500000e-01 : f32
    %114 = vector.broadcast %cst_34 : f32 to vector<24x24xf32>
    %115 = arith.mulf %113, %114 : vector<24x24xf32>
    %116 = arith.addf %115, %41 : vector<24x24xf32>
    %cst_35 = arith.constant dense<0xFF800000> : vector<24xf32>
    %117 = vector.multi_reduction <maximumf>, %116, %cst_35 [1] : vector<24x24xf32> to vector<24xf32>
    %118 = vector.shape_cast %117 : vector<24xf32> to vector<24x1xf32>
    %119 = vector.broadcast %118 : vector<24x1xf32> to vector<24x24xf32>
    %120 = arith.subf %116, %119 : vector<24x24xf32>
    %121 = math.exp %120 : vector<24x24xf32>
    %cst_36 = arith.constant dense<0.000000e+00> : vector<24xf32>
    %122 = vector.multi_reduction <add>, %121, %cst_36 [1] : vector<24x24xf32> to vector<24xf32>
    %123 = vector.shape_cast %122 : vector<24xf32> to vector<24x1xf32>
    %124 = tpu.reciprocal %123 {approx = true} : vector<24x1xf32> -> vector<24x1xf32>
    %125 = vector.broadcast %124 : vector<24x1xf32> to vector<24x24xf32>
    %126 = arith.mulf %121, %125 : vector<24x24xf32>
    %127 = arith.truncf %126 : vector<24x24xf32> to vector<24x24xbf16>
    %128 = arith.truncf %110 : vector<24x16xf32> to vector<24x16xbf16>
    %cst_37 = arith.constant dense<0.000000e+00> : vector<24x16xf32>
    %129 = tpu.matmul %127, %128, %cst_37 {dimension_numbers = #tpu.dot_dimension_numbers<[1], [0], [0], [1], [0, 0, 1, 1], [], []>} : vector<24x24xbf16>, vector<24x16xbf16>, vector<24x16xf32> -> vector<24x16xf32>
    %130 = tpu.concatenate %63, %85, %107, %129 in 1 : vector<24x16xf32>, vector<24x16xf32>, vector<24x16xf32>, vector<24x16xf32> -> vector<24x64xf32>
    %131 = arith.truncf %130 : vector<24x64xf32> to vector<24x64xbf16>
    %c0_38 = arith.constant 0 : index
    %c0_39 = arith.constant 0 : index
    %c0_40 = arith.constant 0 : index
    %132 = vector.load %arg15[%c0_38, %c0_39, %c0_40] : memref<1x64x64xbf16, #tpu.memory_space<vmem>>, vector<1x64x64xbf16>
    %133 = vector.shape_cast %132 : vector<1x64x64xbf16> to vector<64x64xbf16>
    %cst_41 = arith.constant dense<0.000000e+00> : vector<24x64xf32>
    %134 = tpu.matmul %131, %133, %cst_41 {dimension_numbers = #tpu.dot_dimension_numbers<[1], [0], [0], [1], [0, 0, 1, 1], [], []>} : vector<24x64xbf16>, vector<64x64xbf16>, vector<24x64xf32> -> vector<24x64xf32>
    %c0_42 = arith.constant 0 : index
    %c0_43 = arith.constant 0 : index
    %c0_44 = arith.constant 0 : index
    %135 = vector.load %arg16[%c0_42, %c0_43, %c0_44] : memref<1x1x64xf32, #tpu.memory_space<vmem>>, vector<1x1x64xf32>
    %136 = vector.shape_cast %135 : vector<1x1x64xf32> to vector<1x64xf32>
    %137 = vector.broadcast %136 : vector<1x64xf32> to vector<24x64xf32>
    %138 = arith.addf %134, %137 : vector<24x64xf32>
    %139 = arith.addf %3, %138 : vector<24x64xf32>
    %140 = vector.extract_strided_slice %5 {offsets = [2, 0], sizes = [1, 64], strides = [1, 1]} : vector<4x64xf32> to vector<1x64xf32>
    %141 = vector.extract_strided_slice %5 {offsets = [3, 0], sizes = [1, 64], strides = [1, 1]} : vector<4x64xf32> to vector<1x64xf32>
    %cst_45 = arith.constant dense<0.000000e+00> : vector<24xf32>
    %142 = vector.multi_reduction <add>, %139, %cst_45 [1] : vector<24x64xf32> to vector<24xf32>
    %143 = vector.shape_cast %142 : vector<24xf32> to vector<24x1xf32>
    %cst_46 = arith.constant 6.400000e+01 : f32
    %144 = vector.broadcast %cst_46 : f32 to vector<24x1xf32>
    %145 = arith.divf %143, %144 : vector<24x1xf32>
    %146 = vector.broadcast %145 : vector<24x1xf32> to vector<24x64xf32>
    %147 = arith.subf %139, %146 : vector<24x64xf32>
    %148 = arith.mulf %147, %147 : vector<24x64xf32>
    %cst_47 = arith.constant dense<0.000000e+00> : vector<24xf32>
    %149 = vector.multi_reduction <add>, %148, %cst_47 [1] : vector<24x64xf32> to vector<24xf32>
    %150 = vector.shape_cast %149 : vector<24xf32> to vector<24x1xf32>
    %cst_48 = arith.constant 6.400000e+01 : f32
    %151 = vector.broadcast %cst_48 : f32 to vector<24x1xf32>
    %152 = arith.divf %150, %151 : vector<24x1xf32>
    %cst_49 = arith.constant 9.99999997E-7 : f32
    %153 = vector.broadcast %cst_49 : f32 to vector<24x1xf32>
    %154 = arith.addf %152, %153 : vector<24x1xf32>
    %155 = math.rsqrt %154 : vector<24x1xf32>
    %156 = vector.broadcast %155 : vector<24x1xf32> to vector<24x64xf32>
    %157 = arith.mulf %147, %156 : vector<24x64xf32>
    %158 = vector.broadcast %140 : vector<1x64xf32> to vector<24x64xf32>
    %159 = arith.mulf %157, %158 : vector<24x64xf32>
    %160 = vector.broadcast %141 : vector<1x64xf32> to vector<24x64xf32>
    %161 = arith.addf %159, %160 : vector<24x64xf32>
    %162 = arith.truncf %161 : vector<24x64xf32> to vector<24x64xbf16>
    %c0_50 = arith.constant 0 : index
    %c0_51 = arith.constant 0 : index
    %c0_52 = arith.constant 0 : index
    %163 = vector.load %arg17[%c0_50, %c0_51, %c0_52] : memref<1x64x128xbf16, #tpu.memory_space<vmem>>, vector<1x64x128xbf16>
    %164 = vector.shape_cast %163 : vector<1x64x128xbf16> to vector<64x128xbf16>
    %cst_53 = arith.constant dense<0.000000e+00> : vector<24x128xf32>
    %165 = tpu.matmul %162, %164, %cst_53 {dimension_numbers = #tpu.dot_dimension_numbers<[1], [0], [0], [1], [0, 0, 1, 1], [], []>} : vector<24x64xbf16>, vector<64x128xbf16>, vector<24x128xf32> -> vector<24x128xf32>
    %c0_54 = arith.constant 0 : index
    %c0_55 = arith.constant 0 : index
    %c0_56 = arith.constant 0 : index
    %166 = vector.load %arg18[%c0_54, %c0_55, %c0_56] : memref<1x1x128xf32, #tpu.memory_space<vmem>>, vector<1x1x128xf32>
    %167 = vector.shape_cast %166 : vector<1x1x128xf32> to vector<1x128xf32>
    %168 = vector.broadcast %167 : vector<1x128xf32> to vector<24x128xf32>
    %169 = arith.addf %165, %168 : vector<24x128xf32>
    %cst_57 = arith.constant 5.000000e-01 : f32
    %170 = vector.broadcast %cst_57 : f32 to vector<24x128xf32>
    %171 = arith.mulf %170, %169 : vector<24x128xf32>
    %cst_58 = arith.constant 0.707106769 : f32
    %172 = vector.broadcast %cst_58 : f32 to vector<24x128xf32>
    %173 = arith.mulf %169, %172 : vector<24x128xf32>
    %174 = math.erf %173 : vector<24x128xf32>
    %cst_59 = arith.constant 1.000000e+00 : f32
    %175 = vector.broadcast %cst_59 : f32 to vector<24x128xf32>
    %176 = arith.addf %175, %174 : vector<24x128xf32>
    %177 = arith.mulf %171, %176 : vector<24x128xf32>
    %178 = arith.truncf %177 : vector<24x128xf32> to vector<24x128xbf16>
    %c0_60 = arith.constant 0 : index
    %c0_61 = arith.constant 0 : index
    %c0_62 = arith.constant 0 : index
    %179 = vector.load %arg19[%c0_60, %c0_61, %c0_62] : memref<1x128x64xbf16, #tpu.memory_space<vmem>>, vector<1x128x64xbf16>
    %180 = vector.shape_cast %179 : vector<1x128x64xbf16> to vector<128x64xbf16>
    %cst_63 = arith.constant dense<0.000000e+00> : vector<24x64xf32>
    %181 = tpu.matmul %178, %180, %cst_63 {dimension_numbers = #tpu.dot_dimension_numbers<[1], [0], [0], [1], [0, 0, 1, 1], [], []>} : vector<24x128xbf16>, vector<128x64xbf16>, vector<24x64xf32> -> vector<24x64xf32>
    %c0_64 = arith.constant 0 : index
    %c0_65 = arith.constant 0 : index
    %c0_66 = arith.constant 0 : index
    %182 = vector.load %arg20[%c0_64, %c0_65, %c0_66] : memref<1x1x64xf32, #tpu.memory_space<vmem>>, vector<1x1x64xf32>
    %183 = vector.shape_cast %182 : vector<1x1x64xf32> to vector<1x64xf32>
    %184 = vector.broadcast %183 : vector<1x64xf32> to vector<24x64xf32>
    %185 = arith.addf %181, %184 : vector<24x64xf32>
    %186 = arith.addf %139, %185 : vector<24x64xf32>
    %c0_67 = arith.constant 0 : index
    %c0_68 = arith.constant 0 : index
    %187 = vector.load %arg25[%c0_67, %c0_68] : memref<24x64xf32, #tpu.memory_space<vmem>>, vector<24x64xf32>
    tpu.vector_store %arg25[%c0_67, %c0_68], %186 {strides = array<i32>} : memref<24x64xf32, #tpu.memory_space<vmem>>, vector<24x64xf32>,
    %c1_i32 = arith.constant 1 : i32
    %188 = arith.cmpi eq, %arg1, %c1_i32 : i32
    %189 = arith.extui %188 : i1 to i32
    %c0_i32_69 = arith.constant 0 : i32
    %190 = arith.cmpi ne, %189, %c0_i32_69 : i32
    scf.if %190 {
      %c0_70 = arith.constant 0 : index
      %c0_71 = arith.constant 0 : index
      %191 = vector.load %arg25[%c0_70, %c0_71] : memref<24x64xf32, #tpu.memory_space<vmem>>, vector<1x64xf32>
      %c0_72 = arith.constant 0 : index
      %c0_73 = arith.constant 0 : index
      %192 = vector.load %arg21[%c0_72, %c0_73] : memref<2x64xf32, #tpu.memory_space<vmem>>, vector<1x64xf32>
      %c1 = arith.constant 1 : index
      %c0_74 = arith.constant 0 : index
      %193 = vector.load %arg21[%c1, %c0_74] : memref<2x64xf32, #tpu.memory_space<vmem>>, vector<1x64xf32>
      %cst_75 = arith.constant dense<0.000000e+00> : vector<1xf32>
      %194 = vector.multi_reduction <add>, %191, %cst_75 [1] : vector<1x64xf32> to vector<1xf32>
      %195 = vector.shape_cast %194 : vector<1xf32> to vector<1x1xf32>
      %cst_76 = arith.constant 6.400000e+01 : f32
      %196 = vector.broadcast %cst_76 : f32 to vector<1x1xf32>
      %197 = arith.divf %195, %196 : vector<1x1xf32>
      %198 = vector.broadcast %197 : vector<1x1xf32> to vector<1x64xf32>
      %199 = arith.subf %191, %198 : vector<1x64xf32>
      %200 = arith.mulf %199, %199 : vector<1x64xf32>
      %cst_77 = arith.constant dense<0.000000e+00> : vector<1xf32>
      %201 = vector.multi_reduction <add>, %200, %cst_77 [1] : vector<1x64xf32> to vector<1xf32>
      %202 = vector.shape_cast %201 : vector<1xf32> to vector<1x1xf32>
      %cst_78 = arith.constant 6.400000e+01 : f32
      %203 = vector.broadcast %cst_78 : f32 to vector<1x1xf32>
      %204 = arith.divf %202, %203 : vector<1x1xf32>
      %cst_79 = arith.constant 9.99999997E-7 : f32
      %205 = vector.broadcast %cst_79 : f32 to vector<1x1xf32>
      %206 = arith.addf %204, %205 : vector<1x1xf32>
      %207 = math.rsqrt %206 : vector<1x1xf32>
      %208 = vector.broadcast %207 : vector<1x1xf32> to vector<1x64xf32>
      %209 = arith.mulf %199, %208 : vector<1x64xf32>
      %210 = arith.mulf %209, %192 : vector<1x64xf32>
      %211 = arith.addf %210, %193 : vector<1x64xf32>
      %212 = arith.truncf %211 : vector<1x64xf32> to vector<1x64xbf16>
      %c0_80 = arith.constant 0 : index
      %c0_81 = arith.constant 0 : index
      %213 = vector.load %arg22[%c0_80, %c0_81] : memref<64x5xbf16, #tpu.memory_space<vmem>>, vector<64x5xbf16>
      %cst_82 = arith.constant dense<0.000000e+00> : vector<1x5xf32>
      %214 = tpu.matmul %212, %213, %cst_82 {dimension_numbers = #tpu.dot_dimension_numbers<[1], [0], [0], [1], [0, 0, 1, 1], [], []>} : vector<1x64xbf16>, vector<64x5xbf16>, vector<1x5xf32> -> vector<1x5xf32>
      %c0_83 = arith.constant 0 : index
      %c0_84 = arith.constant 0 : index
      %215 = vector.load %arg23[%c0_83, %c0_84] : memref<1x5xf32, #tpu.memory_space<vmem>>, vector<1x5xf32>
      %216 = arith.addf %214, %215 : vector<1x5xf32>
      %c0_85 = arith.constant 0 : index
      %c0_86 = arith.constant 0 : index
      %c0_87 = arith.constant 0 : index
      %217 = vector.load %arg24[%c0_85, %c0_86, %c0_87] : memref<1x1x5xf32, #tpu.memory_space<vmem>>, vector<1x1x5xf32>
      %218 = vector.shape_cast %217 : vector<1x1x5xf32> to vector<1x5xf32>
      %219 = vector.shape_cast %216 : vector<1x5xf32> to vector<1x1x5xf32>
      tpu.vector_store %arg24[%c0_85, %c0_86, %c0_87], %219 {strides = array<i32>} : memref<1x1x5xf32, #tpu.memory_space<vmem>>, vector<1x1x5xf32>,
    } else {
    }
    return
  }
  func.func @transform_0(%arg0: i32, %arg1: i32) -> (i32, i32, i32) {
    %c0_i32 = arith.constant 0 : i32
    %c0_i32_0 = arith.constant 0 : i32
    %c0_i32_1 = arith.constant 0 : i32
    return %arg0, %c0_i32, %c0_i32_0 : i32, i32, i32
  }
  func.func @transform_1(%arg0: i32, %arg1: i32) -> (i32, i32) {
    %c0_i32 = arith.constant 0 : i32
    %c0_i32_0 = arith.constant 0 : i32
    %c0_i32_1 = arith.constant 0 : i32
    return %c0_i32, %c0_i32_0 : i32, i32
  }
  func.func @transform_2(%arg0: i32, %arg1: i32) -> (i32, i32) {
    %c0_i32 = arith.constant 0 : i32
    %c0_i32_0 = arith.constant 0 : i32
    %c0_i32_1 = arith.constant 0 : i32
    return %c0_i32, %c0_i32_0 : i32, i32
  }
  func.func @transform_3(%arg0: i32, %arg1: i32) -> (i32, i32) {
    %c0_i32 = arith.constant 0 : i32
    %c0_i32_0 = arith.constant 0 : i32
    %c0_i32_1 = arith.constant 0 : i32
    return %c0_i32, %c0_i32_0 : i32, i32
  }
  func.func @transform_4(%arg0: i32, %arg1: i32) -> (i32, i32) {
    %c0_i32 = arith.constant 0 : i32
    %c0_i32_0 = arith.constant 0 : i32
    %c0_i32_1 = arith.constant 0 : i32
    return %c0_i32, %c0_i32_0 : i32, i32
  }
  func.func @transform_5(%arg0: i32, %arg1: i32) -> (i32, i32) {
    %c0_i32 = arith.constant 0 : i32
    %c0_i32_0 = arith.constant 0 : i32
    %c0_i32_1 = arith.constant 0 : i32
    return %c0_i32, %c0_i32_0 : i32, i32
  }
  func.func @transform_6(%arg0: i32, %arg1: i32) -> (i32, i32) {
    %c0_i32 = arith.constant 0 : i32
    %c0_i32_0 = arith.constant 0 : i32
    %c0_i32_1 = arith.constant 0 : i32
    return %c0_i32, %c0_i32_0 : i32, i32
  }
  func.func @transform_7(%arg0: i32, %arg1: i32) -> (i32, i32) {
    %c0_i32 = arith.constant 0 : i32
    %c0_i32_0 = arith.constant 0 : i32
    %c0_i32_1 = arith.constant 0 : i32
    return %c0_i32, %c0_i32_0 : i32, i32
  }
  func.func @transform_8(%arg0: i32, %arg1: i32) -> (i32, i32) {
    %c0_i32 = arith.constant 0 : i32
    %c0_i32_0 = arith.constant 0 : i32
    %c0_i32_1 = arith.constant 0 : i32
    return %c0_i32, %c0_i32_0 : i32, i32
  }
  func.func @transform_9(%arg0: i32, %arg1: i32) -> (i32, i32) {
    %c0_i32 = arith.constant 0 : i32
    %c0_i32_0 = arith.constant 0 : i32
    %c0_i32_1 = arith.constant 0 : i32
    return %c0_i32, %c0_i32_0 : i32, i32
  }
  func.func @transform_10(%arg0: i32, %arg1: i32) -> (i32, i32, i32) {
    %c0_i32 = arith.constant 0 : i32
    %c0_i32_0 = arith.constant 0 : i32
    %c0_i32_1 = arith.constant 0 : i32
    return %arg1, %c0_i32, %c0_i32_0 : i32, i32, i32
  }
  func.func @transform_11(%arg0: i32, %arg1: i32) -> (i32, i32, i32) {
    %c0_i32 = arith.constant 0 : i32
    %c0_i32_0 = arith.constant 0 : i32
    %c0_i32_1 = arith.constant 0 : i32
    return %arg1, %c0_i32, %c0_i32_0 : i32, i32, i32
  }
  func.func @transform_12(%arg0: i32, %arg1: i32) -> (i32, i32, i32) {
    %c0_i32 = arith.constant 0 : i32
    %c0_i32_0 = arith.constant 0 : i32
    %c0_i32_1 = arith.constant 0 : i32
    return %arg1, %c0_i32, %c0_i32_0 : i32, i32, i32
  }
  func.func @transform_13(%arg0: i32, %arg1: i32) -> (i32, i32, i32) {
    %c0_i32 = arith.constant 0 : i32
    %c0_i32_0 = arith.constant 0 : i32
    %c0_i32_1 = arith.constant 0 : i32
    return %arg1, %c0_i32, %c0_i32_0 : i32, i32, i32
  }
  func.func @transform_14(%arg0: i32, %arg1: i32) -> (i32, i32, i32) {
    %c0_i32 = arith.constant 0 : i32
    %c0_i32_0 = arith.constant 0 : i32
    %c0_i32_1 = arith.constant 0 : i32
    return %arg1, %c0_i32, %c0_i32_0 : i32, i32, i32
  }
  func.func @transform_15(%arg0: i32, %arg1: i32) -> (i32, i32, i32) {
    %c0_i32 = arith.constant 0 : i32
    %c0_i32_0 = arith.constant 0 : i32
    %c0_i32_1 = arith.constant 0 : i32
    return %arg1, %c0_i32, %c0_i32_0 : i32, i32, i32
  }
  func.func @transform_16(%arg0: i32, %arg1: i32) -> (i32, i32, i32) {
    %c0_i32 = arith.constant 0 : i32
    %c0_i32_0 = arith.constant 0 : i32
    %c0_i32_1 = arith.constant 0 : i32
    return %arg1, %c0_i32, %c0_i32_0 : i32, i32, i32
  }
  func.func @transform_17(%arg0: i32, %arg1: i32) -> (i32, i32, i32) {
    %c0_i32 = arith.constant 0 : i32
    %c0_i32_0 = arith.constant 0 : i32
    %c0_i32_1 = arith.constant 0 : i32
    return %arg1, %c0_i32, %c0_i32_0 : i32, i32, i32
  }
  func.func @transform_18(%arg0: i32, %arg1: i32) -> (i32, i32, i32) {
    %c0_i32 = arith.constant 0 : i32
    %c0_i32_0 = arith.constant 0 : i32
    %c0_i32_1 = arith.constant 0 : i32
    return %arg1, %c0_i32, %c0_i32_0 : i32, i32, i32
  }
  func.func @transform_19(%arg0: i32, %arg1: i32) -> (i32, i32) {
    %c0_i32 = arith.constant 0 : i32
    %c0_i32_0 = arith.constant 0 : i32
    %c0_i32_1 = arith.constant 0 : i32
    return %c0_i32, %c0_i32_0 : i32, i32
  }
  func.func @transform_20(%arg0: i32, %arg1: i32) -> (i32, i32) {
    %c0_i32 = arith.constant 0 : i32
    %c0_i32_0 = arith.constant 0 : i32
    %c0_i32_1 = arith.constant 0 : i32
    return %c0_i32, %c0_i32_0 : i32, i32
  }
  func.func @transform_21(%arg0: i32, %arg1: i32) -> (i32, i32) {
    %c0_i32 = arith.constant 0 : i32
    %c0_i32_0 = arith.constant 0 : i32
    %c0_i32_1 = arith.constant 0 : i32
    return %c0_i32, %c0_i32_0 : i32, i32
  }
  func.func @transform_22(%arg0: i32, %arg1: i32) -> (i32, i32, i32) {
    %c0_i32 = arith.constant 0 : i32
    %c0_i32_0 = arith.constant 0 : i32
    %c0_i32_1 = arith.constant 0 : i32
    return %arg0, %c0_i32, %c0_i32_0 : i32, i32, i32
  }
}

</mosaic_0001>

<bundles_post_ra>
// kernel: cnn_vit_forward.1
= control target key start
LH: loop header
LB: loop body
LE: loop exit
PB: predicated region body
PF: predicated region fallthrough
CT: control target
= control target key end

     0   :  { %s4053_s0 = inlined_call_operand.vmem [shape: f32[2,16,48], index: 0, kind: input, shape index: {}]   ;;  %s4054_s1 = inlined_call_operand.vmem [shape: f32[24,64], index: 1, kind: input, shape index: {}]   ;;  %s4055_s2 = inlined_call_operand.vmem [shape: bf16[48,32], index: 2, kind: input, shape index: {}]   ;;  %s4056_s3 = inlined_call_operand.vmem [shape: f32[1,32], index: 3, kind: input, shape index: {}]   ;;  %s4057_s4 = inlined_call_operand.vmem [shape: bf16[32,10], index: 4, kind: input, shape index: {}]   ;;  %s4058_s5 = inlined_call_operand.vmem [shape: f32[1,10], index: 5, kind: input, shape index: {}]   ;;  %s4059_s6 = inlined_call_operand.vmem [shape: bf16[10,64], index: 6, kind: input, shape index: {}]   ;;  %s4060_s7 = inlined_call_operand.vmem [shape: f32[1,64], index: 7, kind: input, shape index: {}]   ;;  %s4061_s8 = inlined_call_operand.vmem [shape: bf16[48,64], index: 8, kind: input, shape index: {}]   ;;  %s4062_s9 = inlined_call_operand.vmem [shape: f32[1,64], index: 9, kind: input, shape index: {}]   ;;  %s4063_s10 = inlined_call_operand.vmem [shape: f32[2,4,64], index: 10, kind: input, shape index: {}]   ;;  %s4064_s11 = inlined_call_operand.vmem [shape: bf16[2,64,192], index: 11, kind: input, shape index: {}]   ;;  %s4065_s12 = inlined_call_operand.vmem [shape: f32[2,1,192], index: 12, kind: input, shape index: {}]   ;;  %s4066_s13 = inlined_call_operand.vmem [shape: bf16[2,64,64], index: 13, kind: input, shape index: {}]   ;;  %s4067_s14 = inlined_call_operand.vmem [shape: f32[2,1,64], index: 14, kind: input, shape index: {}]   ;;  %s4068_s15 = inlined_call_operand.vmem [shape: bf16[2,64,128], index: 15, kind: input, shape index: {}]   ;;  %s4069_s16 = inlined_call_operand.vmem [shape: f32[2,1,128], index: 16, kind: input, shape index: {}]   ;;  %s4070_s17 = inlined_call_operand.vmem [shape: bf16[2,128,64], index: 17, kind: input, shape index: {}]   ;;  %s4071_s18 = inlined_call_operand.vmem [shape: f32[2,1,64], index: 18, kind: input, shape index: {}]   ;;  %s4072_s19 = inlined_call_operand.vmem [shape: f32[2,64], index: 19, kind: input, shape index: {}]   ;;  %s4073_s20 = inlined_call_operand.vmem [shape: bf16[64,5], index: 20, kind: input, shape index: {}]   ;;  %s4074_s21 = inlined_call_operand.vmem [shape: f32[1,5], index: 21, kind: input, shape index: {}]   ;;  %s4075_s22 = inlined_call_operand.hbm [shape: f32[2,1,5], index: 22, kind: output, shape index: {}]  }
   0x1   :  { %4093 = sst [smem:[#allocation18_spill]] %s4053_s0 }
   0x2   :  { %4094 = sst [smem:[#allocation19_spill]] %s4054_s1 }
   0x3   :  { %4095 = sst [smem:[#allocation20_spill]] %s4055_s2 }
   0x4   :  { %4096 = sst [smem:[#allocation21_spill]] %s4056_s3 }
   0x5   :  { %4097 = sst [smem:[#allocation22_spill]] %s4057_s4 }
   0x6   :  { %4098 = sst [smem:[#allocation23_spill]] %s4058_s5 }
   0x7   :  { %4099 = sst [smem:[#allocation24_spill]] %s4059_s6 }
   0x8   :  { %4100 = sst [smem:[#allocation25_spill]] %s4060_s7 }
   0x9   :  { %4101 = sst [smem:[#allocation26_spill]] %s4063_s10 }
   0xa   :  { %4102 = sst [smem:[#allocation27_spill]] %s4064_s11 }
   0xb   :  { %4103 = sst [smem:[#allocation28_spill]] %s4065_s12 }
   0xc   :  { %4104 = sst [smem:[#allocation29_spill]] %s4066_s13 }
   0xd   :  { %4105 = sst [smem:[#allocation30_spill]] %s4072_s19 }
   0xe   :  { %4106 = sst [smem:[#allocation31_spill]] %s4073_s20 }
   0xf   :  { %4107 = sst [smem:[#allocation32_spill]] %s4074_s21 }
  0x10   :  { %4108 = sst [smem:[#allocation33_spill]] %s4075_s22 }
  0x11   :  { %27 = vsyncpa [#allocation4], 0 }
  0x12   :  { %29 = vsyncpa [#allocation4 + $0x1], 0  ;;  %s3511_s3 = smov 0   ;;  %s3513_s28 = smov 0  }
  0x13   :  { %s3515_s29 = smov 0   ;;  %s3517_s30 = smov 0  }
  0x14   :  { %s3519_s4 = smov 0   ;;  %s3521_s0 = smov 0  }
  0x15   :  { %s3523_s23 = smov 0   ;;  %s3525_s1 = smov 0  }
  0x16 LB: > { %4109 = sst [smem:[#allocation6_spill]] %s3352_s3  ;;  %s2741_s5 = sadd.s32 4294967295, %s3380_s1   ;;  %s3380_s1 = sphi %s3525_s1, %s35_s1   ;;  %s3376_s23 = sphi %s3523_s23, %s4156_s23   ;;  %s3372_s0 = sphi %s3521_s0, %s4155_s0   ;;  %s3368_s4 = sphi %s3519_s4, %s4159_s4   ;;  %s3364_s30 = sphi %s3517_s30, %s4153_s30   ;;  %s3360_s29 = sphi %s3515_s29, %s4152_s29   ;;  %s3356_s28 = sphi %s3513_s28, %s4158_s28   ;;  %s3352_s3 = sphi %s3511_s3, %s4157_s3  }
  0x17   : > { %4110 = sst [smem:[#allocation7_spill]] %s3360_s29  ;;  %s2742_s24 = sadd.s32 4294967294, %s3380_s1  }
  0x18   : > { %4111 = sst [smem:[#allocation8_spill]] %s3368_s4  ;;  %s44_s6 = sadd.s32 1, %s3372_s0 }
  0x19   : > { %4112 = sst [smem:[#allocation9_spill]] %s3372_s0  ;;  %p45_p0 = scmp.ge.s32.totalorder %s44_s6, 2 }
  0x1a   : > { %4113 = sst [smem:[#allocation10_spill]] %s3376_s23  ;;  %s47_s25 = sadd.s32 1, %s3376_s23 }
  0x1b   : > { %4114 = sst [smem:[#allocation11_spill]] %s3380_s1  ;;  %p576_p1 = scmp.ne.s32.totalorder %s3360_s29, %s3356_s28 }
  0x1c   : > { %p577_p2 = scmp.eq.s32.totalorder %s2741_s5, 3  ;;  %s4161_s6 = smov (%p45_p0, %s44_s6), 0 }
  0x1d   : > { %4115 = sst [smem:[#allocation12_spill]] %s4161_s6  ;;  %s4163_s25 = smov (!%p45_p0, %s47_s25), %s3376_s23 }
  0x1e   : > { %p3560_p3 = por %p577_p2, %p576_p1  ;;  %p582_p4 = scmp.ne.s32.totalorder %s3356_s28, %s3352_s3 }
  0x1f   : > { %p49_p5 = scmp.ge.s32.totalorder %s4163_s25, 2  ;;  %p583_p6 = scmp.eq.s32.totalorder %s2742_s24, 3 }
  0x20   : > { %s4116_s26 = scalar_select %p3560_p3, 1, 0 }
  0x21   : > { %p2745_p7 = scmp.ge.s32.totalorder %s3380_s1, 1  ;;  %p709_p8 = scmp.lt.s32.totalorder %s3380_s1, 5 }
  0x22   : > { %4117 = sst [smem:[#allocation13_spill]] %s4116_s26  ;;  %s4165_s25 = smov (%p49_p5, %s4163_s25), 0 }
  0x23   : > { %4118 = sst [smem:[#allocation14_spill]] %s4165_s25  ;;  %p3570_p9 = por %p583_p6, %p582_p4 }
  0x24   : > { %p710_p10 = pnand %p2745_p7, %p709_p8  ;;  %s563_s27 = ssub.s32 %s3376_s23, %s4165_s25 }
  0x25   : > { %s4119_s2 = scalar_select %p3570_p9, 1, 0 }
  0x26   : > { %s566_s5 = sadd.s32 1, %s3360_s29  ;;  %p564_p11 = scmp.eq.s32.totalorder %s563_s27, 0 }
  0x27   : > { %4120 = sst [smem:[#allocation15_spill]] %s4119_s2  ;;  %713 = sbr.rel (%p710_p10) target bundleno = 4487 (0x1187), region = 108 }
  0x28   : > { %s3578_s6 = scalar_select %p564_p11, %s3360_s29, %s566_s5  }
  0x2a   : > { %4121 = sst [smem:[#allocation16_spill]] %s3578_s6 }
  0x2e   : > { %p807_p12 = scmp.lt.s32.totalorder %s3368_s4, 1  ;;  %p812_p13 = scmp.lt.s32.totalorder %s3364_s30, 1 }
  0x2f   : > { %s4122_s23 = sld [smem:[#allocation18_spill]]  ;;  %s4125_s11 = sld [smem:[#allocation27_spill]] }
  0x30   : > { %s808_s0 = scalar_select %p807_p12, %s3368_s4, 1 }
  0x31   : > { %s3585_s3 = scalar_select %p812_p13, %s3364_s30, 1 }
  0x32   : > { %s2832_s27 = sshll.u32 %s808_s0, 4  ;;  %s4123_s10 = sld [smem:[#allocation26_spill]] }
  0x33   : > { %s2748_s29 = sshll.u32 %s3585_s3, 2  ;;  %s2833_s22 = sshll.u32 %s3585_s3, 6 }
  0x34   : > { %s2751_s19 = sshll.u32 %s3585_s3, 1  ;;  %s4126_s12 = sld [smem:[#allocation28_spill]] }
  0x35   : > { %s811_s6 = scalar_lea.vmem %s4122_s23, %s2832_s27  ;;  %s3600_s21 = scalar_lea.vmem %s4125_s11, %s2833_s22 }
  0x36   : > { %s2834_s25 = sshll.u32 %s3585_s3, 5  ;;  %s4127_s13 = sld [smem:[#allocation29_spill]] }
  0x37   : > { %s3621_s26 = scalar_lea.vmem %s4068_s15, %s2834_s25  ;;  %s840_s7 = scalar_lea.vmem %s4069_s16, %s3585_s3 }
  0x38   : > { %s3594_s1 = scalar_lea.vmem %s4123_s10, %s2748_s29  ;;  %s4128_s29 = sand.u32 1, %s3356_s28  }
  0x39   : > { %4124 = sst [smem:[#allocation17_spill]] %s3594_s1  ;;  %s3638_s2 = scalar_lea.vmem [#allocation3], %s4128_s29 }
  0x3a   : > { %s3606_s0 = scalar_lea.vmem %s4126_s12, %s2751_s19  ;;  %s3630_s12 = scalar_lea.vmem %s4070_s17, %s2833_s22 }
  0x3b   : > { %p2758_p0 = scmp.ne.s32.totalorder %s3364_s30, 0 }
  0x3c   : > { %s3612_s5 = scalar_lea.vmem %s4127_s13, %s2834_s25  ;;  %s848_s13 = scalar_lea.vmem %s4071_s18, %s3585_s3  ;;  %v3382_v1 = vmov (!%p2758_p0), 0.0   ;;  %vm3383_vm0 = vmmov (!%p2758_p0), 0   ;;  %v854_v4 = vld [vmem:[%s811_s6] sm:$0xff] (!%p2758_p0)  ;;  %v855_v5 = vld [vmem:[%s811_s6 + $0x8] sm:$0xff] (!%p2758_p0)  ;;  %vm888_vm1 = vcmask (!%p2758_p0), 392192   ;;  %v3166_v11 = vld [vmem:[%s4061_s8 + $0x10] sm:$0xff] (!%p2758_p0)  }
  0x3d   : > { %853 = sbr.rel (%p2758_p0) target bundleno = 750 (0x2ee), region = 112  ;;  %s4129_s4 = sld [smem:[#allocation20_spill]] (!%p2758_p0)  ;;  %2909 = vmatprep.subr.bf16.mxu0 (!%p2758_p0), %v3382_v1  ;;  %2919 = vmatprep.subr.bf16.mxu1 (!%p2758_p0), %v3382_v1  ;;  %v856_v6 = vpack.c.bf16 (!%p2758_p0), %v855_v5, %v854_v4  ;;  %v3164_v9 = vld [vmem:[%s4061_s8] sm:$0xff] (!%p2758_p0)   ;;  %v3165_v10 = vld [vmem:[%s4061_s8 + $0x8] sm:$0xff] (!%p2758_p0)   ;;  %vm935_vm2 = vcmask (!%p2758_p0), 261120   ;;  %vm1021_vm3 = vcmask (!%p2758_p0), 1044480  }
  0x3e   : > { %2915 = vmatprep.mubr.msk.bf16.mxu0 (!%p2758_p0), %vm3383_vm0, %v3382_v1  ;;  %2923 = vmatprep.mubr.msk.bf16.mxu1 (!%p2758_p0), %vm3383_vm0, %v3382_v1  ;;  %s4131_s27 = sld [smem:[#allocation22_spill]] (!%p2758_p0)  ;;  %s4132_s23 = sld [smem:[#allocation21_spill]] (!%p2758_p0)  ;;  %v2769_v34 = vld [vmem:[%s4062_s9] ss:$0 sm:$0xff] (!%p2758_p0)  ;;  %vm1139_vm4 = vcmask (!%p2758_p0), 1040384   ;;  %vm1154_vm5 = vcmask (!%p2758_p0), 523264  }
  0x3f   : > { %s4133_s6 = sld [smem:[#allocation24_spill]] (!%p2758_p0)  ;;  %s4134_s1 = sld [smem:[#allocation19_spill]] (!%p2758_p0)  ;;  %vm1017_vm6 = vcmask (!%p2758_p0), 80896  }
  0x40   : > { %s4137_s11 = sld [smem:[#allocation25_spill]] (!%p2758_p0) }
  0x43   : > { %s4130_s24 = smov (!%p2758_p0), %s4129_s4  ;;  %v3159_v0 = vld [vmem:[%s4129_s4] sm:$0xff] (!%p2758_p0)  }
  0x44   : > { %2910 = vmatpush3.bf16.msra.mxu0 %v3159_v0  ;;  %v3160_v2 = vld [vmem:[%s4130_s24 + $0x8] sm:$0xff]   ;;  %v3161_v3 = vld [vmem:[%s4130_s24 + $0x10] sm:$0xff]   ;;  %v3162_v7 = vld [vmem:[%s4131_s27] sm:$0xff]  }
  0x45   : > { %2911 = vmatprep.subr.bf16.mxu0 %v3382_v1  ;;  %2920 = vmatpush3.bf16.msra.mxu1 %v3162_v7  ;;  %v3163_v8 = vld [vmem:[%s4131_s27 + $0x8] sm:$0xff]   ;;  %v2759_v12 = vld [vmem:[%s4132_s23] ss:$0 sm:$0xff]  ;;  %s4135_s19 = smov %s4134_s1 }
  0x46   : > { %2921 = vmatprep.subr.bf16.mxu1 %v3382_v1  ;;  %v3167_v30 = vld [vmem:[%s4133_s6] sm:$0x1f]   ;;  %v1149_v43 = vld [vmem:[%s4134_s1 + $0x8] sm:$0xff]  ;;  %v1150_v44 = vld [vmem:[%s4135_s19 + $0x10] sm:$0xff]  ;;  %s4136_s6 = sld [smem:[#allocation23_spill]] }
  0x47   : > { %v1023_v33 = vsel %vm1021_vm3, %v3167_v30, 0  ;;  %v1011_v56 = vld [vmem:[%s4137_s11] sm:$0x1] }
  0x48   : > { %2912 = vmatpush3.bf16.msra.mxu0 %v3160_v2  ;;  %v1148_v59 = vld [vmem:[%s4135_s19] sm:$0xff] }
  0x49   : > { %2913 = vmatprep.subr.bf16.mxu0 %v3382_v1  ;;  %2922 = vmatpush3.bf16.msra.mxu1 %v3163_v8 }
  0x4a   : > { %2927 = vmatprep.subr.bf16.mxu1 %v3382_v1 }
  0x4c   : > { %2914 = vmatpush3.bf16.msra.mxu0 %v3161_v3  ;;  %v952_v49 = vld [vmem:[%s4136_s6] sm:$0x1] }
  0x4d   : > { %2933 = vmatprep.subr.bf16.mxu0 %v3382_v1 }
  0x4f   : > { %2916 = vmatmul.mubr.msk.bf16.vlgmr.msra.gmra.mrb[0].mxu0 %vm888_vm1, %v856_v6 }
  0x50   : > { %2939 = vmatprep.mubr.msk.bf16.mxu0 %vm3383_vm0, %v3382_v1  ;;  %2934 = vmatpush3.bf16.msra.mxu0 %v3164_v9 }
  0x51   : > { %2935 = vmatprep.subr.bf16.mxu0 %v3382_v1 }
  0x54   : > { %2936 = vmatpush3.bf16.msra.mxu0 %v3165_v10 }
  0x55   : > { %2937 = vmatprep.subr.bf16.mxu0 %v3382_v1 }
  0x58   : > { %2938 = vmatpush3.bf16.msra.mxu0 %v3166_v11 }
  0x5b   : > { %2940 = vmatmul.mubr.msk.bf16.vlgmr.msra.gmra.mrb[4].mxu0 %vm888_vm1, %v856_v6 }
 0x122   : > { %v926_v13 = vpop.f32.mrb[0].mxu0 }
 0x123   : > { %v927_v14 = vadd.f32 %v2759_v12, %v926_v13  ;;  %v2917_v15 = vpop.f32.mrb[1].mxu0 }
 0x124   : > { %v929_v16 = vpop.f32.mrb[2].mxu0 }
 0x125   : > { %v933_v17 = vmax.f32 %v927_v14, 0.0  ;;  %v930_v18 = vadd.f32 %v2759_v12, %v929_v16  ;;  %v2918_v19 = vpop.f32.mrb[3].mxu0 }
 0x127   : > { %v934_v20 = vmax.f32 %v930_v18, 0.0  ;;  %v936_v21 = vsel %vm935_vm2, %v933_v17, 0.0 }
 0x129   : > { %v937_v22 = vsel %vm935_vm2, %v934_v20, 0.0 }
 0x12a   : > { %v938_v23 = vadd.f32 %v937_v22, %v936_v21 }
 0x12c   : > { %v939_v24 = vrot.slane %v938_v23, 4 }
 0x12e   : > { %v940_v25 = vadd.f32 %v939_v24, %v938_v23  ;;  %v1130_v35 = vpop.f32.mrb[4].mxu0 }
 0x12f   : > { %v1131_v36 = vadd.f32 %v2769_v34, %v1130_v35  ;;  %v2941_v37 = vpop.f32.mrb[5].mxu0 }
 0x130   : > { %v941_v26 = vrot.slane %v940_v25, 2  ;;  %v1133_v38 = vpop.f32.mrb[6].mxu0 }
 0x131   : > { %v1140_v39 = vrot.slane %v1131_v36, 7  ;;  %v1134_v40 = vadd.f32 %v2769_v34, %v1133_v38  ;;  %v2942_v41 = vpop.f32.mrb[7].mxu0 }
 0x132   : > { %v942_v27 = vadd.f32 %v941_v26, %v940_v25 }
 0x133   : > { %v1141_v42 = vrot.slane %v1134_v40, 7 }
 0x134   : > { %v943_v28 = vrot.slane %v942_v27, 1 }
 0x135   : > { %v1142_v45 = vsel %vm1139_vm4, %v1140_v39, %v1141_v42  ;;  %v1147_v46 = vsel %vm1139_vm4, %v1141_v42, 0.0 }
 0x136   : > { %v944_v29 = vadd.f32 %v943_v28, %v942_v27  ;;  %v1152_v47 = vadd.f32 %v1149_v43, %v1142_v45  ;;  %v1153_v48 = vadd.f32 %v1150_v44, %v1147_v46 }
 0x138   : > { %v946_v31 = vmul.f32 0.0625, %v944_v29  ;;  %1156 = vst.msk [vmem:[#allocation2 + $0x8] sm:$0xff] %vm1154_vm5, %v1152_v47  ;;  %1157 = vst.msk [vmem:[#allocation2 + $0x10] sm:$0xff] %vm1154_vm5, %v1153_v48 }
 0x13a   : > { %v947_v32 = vpack.c.bf16 %v946_v31, %v946_v31 }
 0x13c   : > { %2924 = vmatmul.mubr.msk.bf16.vlgmr.msra.gmra.mrb[0].mxu1 %vm935_vm2, %v947_v32 }
 0x13d   : > { %2928 = vmatpush3.bf16.msra.mxu1 %v1023_v33  ;;  %2929 = vmatprep.mubr.msk.bf16.mxu1 %vm3383_vm0, %v3382_v1 }
 0x20f   : > { %v1002_v50 = vpop.f32.mrb[0].mxu1 }
 0x210   : > { %v1003_v51 = vadd.f32 %v1002_v50, %v952_v49  ;;  %v2925_v52 = vpop.f32.mrb[1].mxu1 }
 0x211   : > { %v1005_v53 = vpop.f32.mrb[2].mxu1 }
 0x212   : > { %v1008_v54 = vpack.c.bf16 %v1003_v51, %v1003_v51  ;;  %v2926_v55 = vpop.f32.mrb[3].mxu1 }
 0x214   : > { %2930 = vmatmul.mubr.msk.bf16.vlgmr.msra.gmra.mrb[4].mxu1 %vm1017_vm6, %v1008_v54 }
 0x2e7   : > { %v1059_v57 = vpop.f32.mrb[4].mxu1 }
 0x2e8   : > { %v1060_v58 = vadd.f32 %v1059_v57, %v1011_v56  ;;  %v2931_v60 = vpop.f32.mrb[5].mxu1 }
 0x2e9   : > { %v1062_v61 = vpop.f32.mrb[6].mxu1 }
 0x2ea   : > { %v1146_v62 = vsel %vm1139_vm4, %v1060_v58, %v1140_v39  ;;  %v2932_v63 = vpop.f32.mrb[7].mxu1 }
 0x2eb   : > { %v1151_v0 = vadd.f32 %v1148_v59, %v1146_v62 }
 0x2ed   : > { %1155 = vst.msk [vmem:[#allocation2] sm:$0xff] %vm1154_vm5, %v1151_v0 }
 0x2ee PF: > { %vm1162_vm7 = vcmask 523264   ;;  %v1160_v2 = vld [vmem:[#allocation2 + $0x10] sm:$0xff]  ;;  %v1159_v3 = vld [vmem:[#allocation2 + $0x8] sm:$0xff]  ;;  %v3384_v30 = vmov 0   ;;  %s4138_s20 = sld [smem:[#allocation17_spill]]  ;;  %v1203_v38 = vlaneseq  ;;  %vm1348_vm8 = vcmask 130048   ;;  %s4139_s11 = scalar_lea.vmem %s4067_s14, %s3585_s3 }
 0x2ef   : > { %v1169_v5 = vsel %vm1162_vm7, %v1160_v2, 0.0  ;;  %v1166_v6 = vsel %vm1162_vm7, %v1159_v3, 0.0  ;;  %v3183_v22 = vld [vmem:[%s3600_s21 + $0x4] ss:$8 sps:$4 sm:$0xff]   ;;  %v3185_v23 = vld [vmem:[%s3600_s21] ss:$8 sps:$4 sm:$0xff]   ;;  %1317 = vmatprep.mubr.bf16.mxu1 %v3384_v30 }
 0x2f0   : > { %1170 = vadd.xlane.f32.xlu1 %v1169_v5  ;;  %1285 = vmatprep.subr.bf16.mxu1 %v3183_v22  ;;  %v3186_v24 = vld [vmem:[%s3600_s21 + $0x14] ss:$8 sps:$4 sm:$0xff]   ;;  %v3188_v25 = vld [vmem:[%s3600_s21 + $0x10] ss:$8 sps:$4 sm:$0xff]   ;;  %v3189_v26 = vld [vmem:[%s3600_s21 + $0x24] ss:$8 sps:$4 sm:$0xff]  }
 0x2f1   : > { %1286 = vmatpush1.bf16.msra.mxu1 %v3185_v23  ;;  %v3191_v27 = vld [vmem:[%s3600_s21 + $0x20] ss:$8 sps:$4 sm:$0xff]   ;;  %v3192_v28 = vld [vmem:[%s3600_s21 + $0x34] ss:$8 sps:$4 sm:$0xff]   ;;  %v3194_v29 = vld [vmem:[%s3600_s21 + $0x30] ss:$8 sps:$4 sm:$0xff]  }
 0x2f2   : > { %1287 = vmatprep.subr.bf16.mxu1 %v3186_v24  ;;  %v3719_v41 = vshrl.u32 %v1203_v38, 7  ;;  %v1227_v61 = vld [vmem:[%s3606_s0] sm:$0x3]  ;;  %s3385_s21 = smov 48   ;;  %s3386_s0 = smov 64   ;;  %vm1459_vm9 = vcmask 1043456  }
 0x2f3   : > { %s3387_s23 = smov 112   ;;  %s3388_s29 = smov 96   ;;  %vm1415_vm11 = vcmask 195584   ;;  %vm2065_vm12 = vcmask 261120   ;;  %vm2069_vm13 = vcmask 392192  }
 0x2f4   : > { %v1158_v1 = vld [vmem:[#allocation2] sm:$0xff]  ;;  %v1205_v42 = vsub.s32 0, %v3719_v41  ;;  %v1212_v47 = vsub.s32 1, %v3719_v41  ;;  %s3389_s10 = smov 32   ;;  %s3391_s6 = smov 16  }
 0x2f5   : > { %v1163_v4 = vsel %vm1162_vm7, %v1158_v1, 0.0  ;;  %1288 = vmatpush1.bf16.msra.mxu1 %v3188_v25  ;;  %v3723_v43 = vld [vmem:[%s4138_s20] sm:$0xf]  ;;  %s3392_s25 = smov 80   ;;  %p2823_p1 = scmp.ne.s32.totalorder %s3364_s30, 1 }
 0x2f6   : > { %1164 = vadd.xlane.f32.xlu0 %v1163_v4  ;;  %1289 = vmatprep.subr.bf16.mxu1 %v3189_v26  ;;  %v1206_v46 = vrot.slane %v3723_v43, %v1205_v42  ;;  %v1213_v52 = vrot.slane %v3723_v43, %v1212_v47  ;;  %v1232_v62 = vrot.slane %v1227_v61, %v1205_v42  ;;  %vm2468_vm14 = vcmask (!%p2823_p1), 516096   ;;  %s4140_s1 = sld [smem:[#allocation31_spill]] (!%p2823_p1) }
 0x2f7   : > { %v1236_v0 = vrot.slane %v1227_v61, %v1212_v47  ;;  %vm3394_vm15 = vmmov (!%p2823_p1), 0   ;;  %vm2561_vm0 = vcmask (!%p2823_p1), 32768  }
 0x2f9   : > { %1290 = vmatpush1.bf16.msra.mxu1 %v3191_v27 }
 0x2fa   : > { %1167 = vadd.xlane.f32.xlu0 %v1166_v6  ;;  %1291 = vmatprep.subr.bf16.mxu1 %v3192_v28 }
 0x2fc   : > { %s4141_s20 = smov (!%p2823_p1), %s4140_s1 }
 0x2fd   : > { %1292 = vmatpush1.bf16.msra.mxu1 %v3194_v29 }
 0x37d   : > { %v1171_v8 = vpop.xlane.xlu1 %1170 }
 0x37e   : > { %v1175_v10 = vmul.f32 0.015625, %v1171_v8 }
 0x380   : > { %v1178_v12 = vsub.f32 %v1160_v2, %v1175_v10 }
 0x382   : > { %v1181_v16 = vmul.f32 %v1178_v12, %v1178_v12 }
 0x383   : > { %v1165_v7 = vpop.xlane.xlu0 %1164 }
 0x384   : > { %v1173_v9 = vmul.f32 0.015625, %v1165_v7  ;;  %v1188_v19 = vsel %vm1162_vm7, %v1181_v16, 0.0 }
 0x386   : > { %v1176_v11 = vsub.f32 %v1158_v1, %v1173_v9 }
 0x387   : > { %v1168_v13 = vpop.xlane.xlu0 %1167 }
 0x388   : > { %v1174_v14 = vmul.f32 0.015625, %v1168_v13  ;;  %v1179_v15 = vmul.f32 %v1176_v11, %v1176_v11 }
 0x38a   : > { %v1177_v17 = vsub.f32 %v1159_v3, %v1174_v14  ;;  %v1182_v18 = vsel %vm1162_vm7, %v1179_v15, 0.0 }
 0x38b   : > { %1183 = vadd.xlane.f32.xlu1 %v1182_v18 }
 0x38c   : > { %v1180_v20 = vmul.f32 %v1177_v17, %v1177_v17 }
 0x38e   : > { %v1185_v21 = vsel %vm1162_vm7, %v1180_v20, 0.0 }
 0x38f   : > { %1189 = vadd.xlane.f32.xlu1 %v1188_v19  ;;  %1186 = vadd.xlane.f32.xlu0 %v1185_v21 }
 0x418   : > { %v1184_v31 = vpop.xlane.xlu1 %1183 }
 0x419   : > { %v1191_v32 = vmul.f32 0.015625, %v1184_v31 }
 0x41b   : > { %v1194_v33 = vadd.f32 1e-06, %v1191_v32 }
 0x41c   : > { %v1190_v34 = vpop.xlane.xlu1 %1189  ;;  %v1187_v35 = vpop.xlane.xlu0 %1186 }
 0x41d   : > { %3211 = vrsqrt.f32 %v1194_v33  ;;  %v1193_v36 = vmul.f32 0.015625, %v1190_v34  ;;  %v1192_v37 = vmul.f32 0.015625, %v1187_v35  ;;  %v1337_v35 = vand.u32 127, %v1203_v38 }
 0x41f   : > { %v1196_v39 = vadd.f32 1e-06, %v1193_v36  ;;  %v1195_v40 = vadd.f32 1e-06, %v1192_v37  ;;  %vm1338_vm10 = vcmp.lt.s32.totalorder %v1337_v35, 17 }
 0x420   : > { %v3390_v37 = vmov -1e+30  }
 0x421   : > { %3213 = vrsqrt.f32 %v1196_v39  ;;  %v3784_v39 = vsel %vm1338_vm10, 0.0, %v3390_v37 }
 0x422   : > { %3215 = vrsqrt.f32 %v1195_v40 }
 0x427   : > { %v3212_v44 = vpop.eup %3211 }
 0x428   : > { %v1200_v45 = vmul.f32 %v3212_v44, %v1176_v11 }
 0x42a   : > { %v1207_v51 = vmul.f32 %v1206_v46, %v1200_v45 }
 0x42b   : > { %v3214_v48 = vpop.eup %3213 }
 0x42c   : > { %v3216_v49 = vpop.eup %3215  ;;  %v1202_v54 = vmul.f32 %v3214_v48, %v1178_v12  ;;  %v1214_v55 = vadd.f32 %v1213_v52, %v1207_v51 }
 0x42d   : > { %v1201_v50 = vmul.f32 %v3216_v49, %v1177_v17 }
 0x42e   : > { %v1209_v58 = vmul.f32 %v1206_v46, %v1202_v54 }
 0x42f   : > { %v1208_v53 = vmul.f32 %v1206_v46, %v1201_v50 }
 0x430   : > { %v1216_v59 = vadd.f32 %v1213_v52, %v1209_v58 }
 0x431   : > { %v1215_v56 = vadd.f32 %v1213_v52, %v1208_v53 }
 0x432   : > { %v1218_v60 = vpack.c.bf16 %v1216_v59, %v1216_v59 }
 0x433   : > { %v1217_v57 = vpack.c.bf16 %v1215_v56, %v1214_v55 }
 0x435   : > { %2782 = vmatmul.mubr.msk.bf16.vlgmr.msra.gmra.mrb[0].mxu1 %vm1162_vm7, %v1217_v57 }
 0x436   : > { %1327 = vmatprep.mubr.bf16.mxu1 %v3384_v30 }
 0x43d   : > { %2783 = vmatmul.mubr.msk.bf16.gmra.mrb[4].mxu1 %vm1162_vm7, %v1218_v60 }
 0x508   : > { %v1319_v63 = vpop.f32.mrb[0].mxu1 }
 0x509   : > { %v1320_v1 = vadd.f32 %v1319_v63, %v1232_v62  ;;  %v1321_v2 = vpop.f32.mrb[1].mxu1 }
 0x50a   : > { %v1323_v3 = vpop.f32.mrb[2].mxu1  ;;  %v1322_v6 = vadd.f32 %v1321_v2, %v1236_v0 }
 0x50b   : > { %v1324_v4 = vadd.f32 %v1323_v3, %v1232_v62  ;;  %v1325_v5 = vpop.f32.mrb[3].mxu1 }
 0x50c   : > { %v1326_v7 = vadd.f32 %v1325_v5, %v1236_v0 }
 0x50d   : > { %v3731_v8 = vpack.c.bf16 %v1324_v4, %v1320_v1 }
 0x50e   : > { %v3733_v9 = vpack.c.bf16 %v1326_v7, %v1322_v6 }
 0x50f   : > { %1515 = vrot.lane.b32.xlu1 %v3731_v8, %s3385_s21  ;;  %1344 = vrot.lane.b32.xlu0 %v3731_v8, %s3386_s0 }
 0x510   : > { %2947 = vmatprep.mubr.msk.bf16.mxu1 %vm1348_vm8, %v3731_v8  ;;  %v1329_v10 = vpop.f32.mrb[4].mxu1 }
 0x511   : > { %v1330_v11 = vadd.f32 %v1329_v10, %v1232_v62  ;;  %v1331_v12 = vpop.f32.mrb[5].mxu1 }
 0x512   : > { %v1333_v13 = vpop.f32.mrb[6].mxu1  ;;  %v1332_v25 = vadd.f32 %v1331_v12, %v1236_v0 }
 0x513   : > { %v3740_v14 = vpack.c.bf16 %v1330_v11, %v1330_v11  ;;  %v1334_v15 = vpop.f32.mrb[7].mxu1  ;;  %1511 = vrot.lane.b32.xlu0 %v3731_v8, %s3387_s23 }
 0x514   : > { %v3768_v28 = vpack.c.bf16 %v1332_v25, %v1332_v25 }
 0x515   : > { %1346 = vrot.lane.b32.xlu1 %v3740_v14, %s3386_s0 }
 0x516   : > { %v1461_v32 = vsel %vm1459_vm9, %v3768_v28, 0 }
 0x517   : > { %1513 = vrot.lane.b32.xlu0 %v3740_v14, %s3387_s23 }
 0x519   : > { %1517 = vrot.lane.b32.xlu1 %v3740_v14, %s3385_s21 }
 0x51b   : > { %1684 = vrot.lane.b32.xlu0 %v3731_v8, %s3388_s29 }
 0x51d   : > { %1688 = vrot.lane.b32.xlu1 %v3731_v8, %s3389_s10 }
 0x521   : > { %1690 = vrot.lane.b32.xlu1 %v3740_v14, %s3389_s10 }
 0x525   : > { %1686 = vrot.lane.b32.xlu1 %v3740_v14, %s3388_s29 }
 0x581   : > { %v1516_v16 = vpop.permute.xlu1 %1515  ;;  %v1345_v17 = vpop.permute.xlu0 %1344 }
 0x582   : > { %v1356_v18 = vsel %vm1348_vm8, %v1345_v17, 0  ;;  %3063 = vmatprep.subr.msk.bf16.mxu1 %vm1348_vm8, %v1345_v17  ;;  %3066 = vmatprep.subr.msk.bf16.mxu0 %vm1348_vm8, %v1516_v16  ;;  %v1526_v19 = vsel %vm1348_vm8, %v1516_v16, 0 }
 0x583   : > { %2944 = vmatpush3.bf16.xpose.msra.mxu1 %v1356_v18  ;;  %2960 = vmatpush3.bf16.xpose.msra.mxu0 %v1526_v19 }
 0x585   : > { %v1512_v20 = vpop.permute.xlu0 %1511 }
 0x586   : > { %2963 = vmatprep.mubr.msk.bf16.mxu0 %vm1348_vm8, %v1512_v20 }
 0x587   : > { %v1347_v21 = vpop.permute.xlu1 %1346 }
 0x588   : > { %3064 = vmatprep.subr.msk.bf16.mxu1 %vm1348_vm8, %v1347_v21  ;;  %v1359_v22 = vsel %vm1348_vm8, %v1347_v21, 0 }
 0x589   : > { %v1514_v26 = vpop.permute.xlu0 %1513 }
 0x58b   : > { %v1518_v23 = vpop.permute.xlu1 %1517  ;;  %2946 = vmatpush3.bf16.xpose.msra.mxu1 %v1359_v22 }
 0x58c   : > { %2951 = vmatprep.subr.bf16.mxu1 %v3733_v9  ;;  %3067 = vmatprep.subr.msk.bf16.mxu0 %vm1348_vm8, %v1518_v23  ;;  %v1529_v24 = vsel %vm1348_vm8, %v1518_v23, 0 }
 0x58d   : > { %2962 = vmatpush3.bf16.xpose.msra.mxu0 %v1529_v24  ;;  %v1685_v29 = vpop.permute.xlu0 %1684 }
 0x58f   : > { %v1689_v27 = vpop.permute.xlu1 %1688 }
 0x590   : > { %3069 = vmatprep.subr.msk.bf16.mxu0 %vm1348_vm8, %v1689_v27  ;;  %v1699_v30 = vsel %vm1348_vm8, %v1689_v27, 0 }
 0x592   : > { %2948 = vmatmul.mubr.msk.bf16.vlgmr.msra.gmra.mrb[8].mxu1 %vm1348_vm8, %v3740_v14 }
 0x593   : > { %2952 = vmatpush3.bf16.msra.mxu1 %v3733_v9  ;;  %v1691_v31 = vpop.permute.xlu1 %1690 }
 0x594   : > { %3065 = vmatprep.subr.msk.bf16.mxu1 %vm1459_vm9, %v3768_v28  ;;  %2964 = vmatmul.mubr.msk.bf16.vlgmr.msra.gmra.mrb[0].mxu0 %vm1348_vm8, %v1514_v26  ;;  %v1702_v33 = vsel %vm1348_vm8, %v1691_v31, 0 }
 0x595   : > { %2976 = vmatpush3.bf16.xpose.msra.mxu0 %v1699_v30  ;;  %2979 = vmatprep.mubr.msk.bf16.mxu0 %vm1348_vm8, %v1685_v29 }
 0x596   : > { %3070 = vmatprep.subr.msk.bf16.mxu0 %vm1348_vm8, %v1691_v31 }
 0x597   : > { %2954 = vmatpush3.bf16.msra.mxu1 %v1461_v32  ;;  %v1687_v34 = vpop.permute.xlu1 %1686 }
 0x59d   : > { %2978 = vmatpush3.bf16.xpose.msra.mxu0 %v1702_v33 }
 0x5a4   : > { %2980 = vmatmul.mubr.msk.bf16.vlgmr.msra.gmra.mrb[4].mxu0 %vm1348_vm8, %v1687_v34 }
 0x665   : > { %v2949_v36 = vpop.f32.mrb[8].mxu1 }
 0x666   : > { %v1395_v40 = vpop.f32.mrb[9].mxu1  ;;  %v1411_v42 = vmul.f32 0.25, %v2949_v36 }
 0x667   : > { %v1409_v44 = vmul.f32 0.25, %v1395_v40  ;;  %v2950_v45 = vpop.f32.mrb[10].mxu1  ;;  %v2965_v46 = vpop.f32.mrb[0].mxu0 }
 0x668   : > { %v1398_v47 = vpop.f32.mrb[11].mxu1  ;;  %v1565_v48 = vpop.f32.mrb[1].mxu0  ;;  %v1581_v49 = vmul.f32 0.25, %v2965_v46  ;;  %v1414_v56 = vadd.f32 %v1411_v42, %v3784_v39 }
 0x669   : > { %v1410_v50 = vmul.f32 0.25, %v1398_v47  ;;  %v2966_v51 = vpop.f32.mrb[2].mxu0  ;;  %v1412_v52 = vadd.f32 %v1409_v44, %v3784_v39  ;;  %v1579_v38 = vmul.f32 0.25, %v1565_v48 }
 0x66a   : > { %v1568_v53 = vpop.f32.mrb[3].mxu0  ;;  %v1584_v58 = vadd.f32 %v1581_v49, %v3784_v39  ;;  %v1422_v60 = vsel %vm1415_vm11, %v1414_v56, -inf }
 0x66b   : > { %v1416_v54 = vsel %vm1415_vm11, %v1412_v52, -inf  ;;  %v1413_v55 = vadd.f32 %v1410_v50, %v3784_v39  ;;  %v1580_v59 = vmul.f32 0.25, %v1568_v53  ;;  %v1582_v61 = vadd.f32 %v1579_v38, %v3784_v39 }
 0x66c   : > { %1417 = vmax.xlane.f32.xlu0 %v1416_v54  ;;  %v1591_v62 = vsel %vm1415_vm11, %v1584_v58, -inf }
 0x66d   : > { %v1419_v57 = vsel %vm1415_vm11, %v1413_v55, -inf  ;;  %v1585_v63 = vsel %vm1415_vm11, %v1582_v61, -inf  ;;  %v3797_v0 = vadd.f32 %v1580_v59, %v3784_v39 }
 0x66e   : > { %1420 = vmax.xlane.f32.xlu1 %v1419_v57 }
 0x66f   : > { %v1588_v2 = vsel %vm1415_vm11, %v3797_v0, -inf }
 0x670   : > { %1423 = vmax.xlane.f32.xlu0 %v1422_v60 }
 0x672   : > { %1592 = vmax.xlane.f32.xlu1 %v1591_v62 }
 0x674   : > { %1586 = vmax.xlane.f32.xlu0 %v1585_v63 }
 0x677   : > { %v2981_v1 = vpop.f32.mrb[4].mxu0 }
 0x678   : > { %v1738_v3 = vpop.f32.mrb[5].mxu0  ;;  %1589 = vmax.xlane.f32.xlu0 %v1588_v2  ;;  %v1754_v4 = vmul.f32 0.25, %v2981_v1 }
 0x679   : > { %v1752_v5 = vmul.f32 0.25, %v1738_v3  ;;  %v2982_v6 = vpop.f32.mrb[6].mxu0 }
 0x67a   : > { %v1741_v7 = vpop.f32.mrb[7].mxu0  ;;  %v1757_v15 = vadd.f32 %v1754_v4, %v3784_v39 }
 0x67b   : > { %v1753_v10 = vmul.f32 0.25, %v1741_v7  ;;  %v1755_v11 = vadd.f32 %v1752_v5, %v3784_v39 }
 0x67c   : > { %v1764_v17 = vsel %vm1415_vm11, %v1757_v15, -inf }
 0x67d   : > { %v1758_v12 = vsel %vm1415_vm11, %v1755_v11, -inf  ;;  %v1756_v13 = vadd.f32 %v1753_v10, %v3784_v39 }
 0x67e   : > { %1759 = vmax.xlane.f32.xlu0 %v1758_v12 }
 0x67f   : > { %v1761_v16 = vsel %vm1415_vm11, %v1756_v13, -inf }
 0x680   : > { %1762 = vmax.xlane.f32.xlu1 %v1761_v16 }
 0x682   : > { %1765 = vmax.xlane.f32.xlu0 %v1764_v17 }
 0x6f9   : > { %v1418_v18 = vpop.xlane.xlu0 %1417 }
 0x6fa   : > { %v1425_v19 = vsub.f32 %v1412_v52, %v1418_v18 }
 0x6fb   : > { %v1421_v20 = vpop.xlane.xlu1 %1420 }
 0x6fc   : > { %v1428_v23 = vmul.f32 1.442695, %v1425_v19  ;;  %v1426_v29 = vsub.f32 %v1413_v55, %v1421_v20 }
 0x6fd   : > { %v1424_v21 = vpop.xlane.xlu0 %1423 }
 0x6fe   : > { %v1427_v22 = vsub.f32 %v1414_v56, %v1424_v21  ;;  %v1430_v33 = vmul.f32 1.442695, %v1426_v29 }
 0x6ff   : > { %v1593_v24 = vpop.xlane.xlu1 %1592 }
 0x700   : > { %v1432_v25 = vmul.f32 1.442695, %v1427_v22  ;;  %v1596_v26 = vsub.f32 %v1584_v58, %v1593_v24 }
 0x701   : > { %v1587_v27 = vpop.xlane.xlu0 %1586 }
 0x702   : > { %3217 = vpow2.f32 %v1432_v25  ;;  %v1601_v30 = vmul.f32 1.442695, %v1596_v26  ;;  %v1594_v31 = vsub.f32 %v1582_v61, %v1587_v27 }
 0x703   : > { %3219 = vpow2.f32 %v1428_v23 }
 0x704   : > { %3221 = vpow2.f32 %v1601_v30  ;;  %v1597_v32 = vmul.f32 1.442695, %v1594_v31 }
 0x705   : > { %v1590_v48 = vpop.xlane.xlu0 %1589 }
 0x706   : > { %3223 = vpow2.f32 %v1597_v32  ;;  %v1595_v51 = vsub.f32 %v3797_v0, %v1590_v48 }
 0x707   : > { %3225 = vpow2.f32 %v1430_v33 }
 0x708   : > { %v1599_v38 = vmul.f32 1.442695, %v1595_v51 }
 0x70a   : > { %3227 = vpow2.f32 %v1599_v38 }
 0x70b   : > { %v1760_v49 = vpop.xlane.xlu0 %1759 }
 0x70c   : > { %v3807_v34 = vpop.eup %3217  ;;  %v1767_v56 = vsub.f32 %v1755_v11, %v1760_v49 }
 0x70d   : > { %v3809_v35 = vpop.eup %3219  ;;  %v1440_v36 = vsel %vm1415_vm11, %v3807_v34, 0.0  ;;  %v1763_v50 = vpop.xlane.xlu1 %1762 }
 0x70e   : > { %v3813_v37 = vpop.eup %3221  ;;  %1441 = vadd.xlane.f32.xlu1 %v1440_v36  ;;  %v1434_v44 = vsel %vm1415_vm11, %v3809_v35, 0.0  ;;  %v1768_v53 = vsub.f32 %v1756_v13, %v1763_v50  ;;  %v1770_v58 = vmul.f32 1.442695, %v1767_v56 }
 0x70f   : > { %v1609_v40 = vsel %vm1415_vm11, %v3813_v37, 0.0  ;;  %v1766_v52 = vpop.xlane.xlu0 %1765 }
 0x710   : > { %v3817_v42 = vpop.eup %3223  ;;  %1610 = vadd.xlane.f32.xlu0 %v1609_v40  ;;  %v1769_v54 = vsub.f32 %v1757_v15, %v1766_v52  ;;  %v1772_v55 = vmul.f32 1.442695, %v1768_v53 }
 0x711   : > { %v1603_v45 = vsel %vm1415_vm11, %v3817_v42, 0.0  ;;  %v3226_v46 = vpop.eup %3225 }
 0x712   : > { %1435 = vadd.xlane.f32.xlu1 %v1434_v44  ;;  %v1437_v47 = vsel %vm1415_vm11, %v3226_v46, 0.0  ;;  %v1774_v57 = vmul.f32 1.442695, %v1769_v54  ;;  %3229 = vpow2.f32 %v1772_v55 }
 0x714   : > { %1604 = vadd.xlane.f32.xlu0 %v1603_v45  ;;  %3231 = vpow2.f32 %v1774_v57  ;;  %v3228_v59 = vpop.eup %3227 }
 0x715   : > { %3233 = vpow2.f32 %v1770_v58  ;;  %v1606_v61 = vsel %vm1415_vm11, %v3228_v59, 0.0 }
 0x718   : > { %1438 = vadd.xlane.f32.xlu0 %v1437_v47 }
 0x71c   : > { %v3831_v60 = vpop.eup %3229 }
 0x71d   : > { %v1779_v63 = vsel %vm1415_vm11, %v3831_v60, 0.0 }
 0x71e   : > { %v3834_v62 = vpop.eup %3231 }
 0x71f   : > { %v1782_v0 = vsel %vm1415_vm11, %v3834_v62, 0.0  ;;  %v3840_v1 = vpop.eup %3233 }
 0x720   : > { %v1776_v2 = vsel %vm1415_vm11, %v3840_v1, 0.0 }
 0x723   : > { %1624 = vrot.lane.b32.xlu1 %v3768_v28, %s3387_s23 }
 0x727   : > { %1793 = vrot.lane.b32.xlu1 %v3733_v9, %s3388_s29 }
 0x72e   : > { %1622 = vrot.lane.b32.xlu0 %v3733_v9, %s3387_s23 }
 0x74b   : > { %1607 = vadd.xlane.f32.xlu1 %v1606_v61 }
 0x74d   : > { %1780 = vadd.xlane.f32.xlu0 %v1779_v63 }
 0x74f   : > { %1783 = vadd.xlane.f32.xlu1 %v1782_v0 }
 0x753   : > { %1777 = vadd.xlane.f32.xlu1 %v1776_v2 }
 0x763   : > { %1859 = vrot.lane.b32.xlu0 %v3731_v8, %s3391_s6 }
 0x764   : > { %1795 = vrot.lane.b32.xlu1 %v3768_v28, %s3388_s29 }
 0x767   : > { %1855 = vrot.lane.b32.xlu0 %v3731_v8, %s3392_s25 }
 0x768   : > { %1861 = vrot.lane.b32.xlu1 %v3740_v14, %s3391_s6 }
 0x76c   : > { %1857 = vrot.lane.b32.xlu1 %v3740_v14, %s3392_s25 }
 0x79b   : > { %v1442_v3 = vpop.xlane.xlu1 %1441 }
 0x79c   : > { %3235 = vrcp.f32 %v1442_v3 }
 0x79d   : > { %v1611_v4 = vpop.xlane.xlu0 %1610 }
 0x79f   : > { %v1436_v5 = vpop.xlane.xlu1 %1435 }
 0x7a0   : > { %3237 = vrcp.f32 %v1436_v5 }
 0x7a1   : > { %v1605_v6 = vpop.xlane.xlu0 %1604 }
 0x7a3   : > { %v1625_v18 = vpop.permute.xlu1 %1624 }
 0x7a4   : > { %v1634_v19 = vsel %vm1459_vm9, %v1625_v18, 0 }
 0x7a5   : > { %v1439_v7 = vpop.xlane.xlu0 %1438 }
 0x7a6   : > { %3239 = vrcp.f32 %v1439_v7  ;;  %v3236_v11 = vpop.eup %3235 }
 0x7a7   : > { %v1448_v8 = vmul.f32 %v3236_v11, %v3807_v34  ;;  %v1794_v20 = vpop.permute.xlu1 %1793  ;;  %3241 = vrcp.f32 %v1611_v4 }
 0x7a8   : > { %3243 = vrcp.f32 %v1605_v6 }
 0x7a9   : > { %v1623_v10 = vpop.permute.xlu0 %1622  ;;  %v1450_v14 = vpack.c.bf16 %v1448_v8, %v1448_v8 }
 0x7aa   : > { %2967 = vmatprep.subr.bf16.mxu1 %v1623_v10  ;;  %v3238_v12 = vpop.eup %3237 }
 0x7ab   : > { %v1446_v15 = vmul.f32 %v3238_v12, %v3809_v35 }
 0x7b0   : > { %v3240_v13 = vpop.eup %3239 }
 0x7b1   : > { %v1447_v16 = vmul.f32 %v3240_v13, %v3226_v46  ;;  %v3242_v24 = vpop.eup %3241 }
 0x7b2   : > { %v3244_v26 = vpop.eup %3243  ;;  %v1617_v29 = vmul.f32 %v3242_v24, %v3813_v37 }
 0x7b3   : > { %v1449_v17 = vpack.c.bf16 %v1447_v16, %v1446_v15  ;;  %v1615_v30 = vmul.f32 %v3244_v26, %v3817_v42 }
 0x7b4   : > { %v1619_v33 = vpack.c.bf16 %v1617_v29, %v1617_v29 }
 0x7b5   : > { %2955 = vmatprep.mubr.msk.bf16.mxu1 %vm1415_vm11, %v1449_v17 }
 0x7b6   : > { %2956 = vmatmul.mubr.msk.bf16.vlgmr.msra.gmra.mrb[12].mxu1 %vm1415_vm11, %v1450_v14 }
 0x7b7   : > { %2968 = vmatpush3.bf16.msra.mxu1 %v1623_v10 }
 0x7b8   : > { %3068 = vmatprep.subr.msk.bf16.mxu1 %vm1459_vm9, %v1625_v18 }
 0x7bb   : > { %2970 = vmatpush3.bf16.msra.mxu1 %v1634_v19 }
 0x7bc   : > { %2983 = vmatprep.subr.bf16.mxu1 %v1794_v20 }
 0x7d8   : > { %v1608_v21 = vpop.xlane.xlu1 %1607 }
 0x7d9   : > { %3245 = vrcp.f32 %v1608_v21 }
 0x7da   : > { %v1781_v22 = vpop.xlane.xlu0 %1780 }
 0x7dc   : > { %v1784_v23 = vpop.xlane.xlu1 %1783 }
 0x7dd   : > { %3247 = vrcp.f32 %v1784_v23 }
 0x7de   : > { %3249 = vrcp.f32 %v1781_v22  ;;  %v1860_v45 = vpop.permute.xlu0 %1859 }
 0x7df   : > { %v1870_v50 = vsel %vm1348_vm8, %v1860_v45, 0 }
 0x7e0   : > { %v1778_v25 = vpop.xlane.xlu1 %1777 }
 0x7e1   : > { %3251 = vrcp.f32 %v1778_v25 }
 0x7e2   : > { %v1856_v49 = vpop.permute.xlu0 %1855 }
 0x7e3   : > { %v3246_v27 = vpop.eup %3245 }
 0x7e4   : > { %v1616_v31 = vmul.f32 %v3246_v27, %v3228_v59  ;;  %v1796_v36 = vpop.permute.xlu1 %1795 }
 0x7e5   : > { %v1805_v46 = vsel %vm1459_vm9, %v1796_v36, 0 }
 0x7e6   : > { %v1618_v32 = vpack.c.bf16 %v1616_v31, %v1615_v30 }
 0x7e7   : > { %v3248_v34 = vpop.eup %3247 }
 0x7e8   : > { %2971 = vmatprep.mubr.msk.bf16.mxu1 %vm1415_vm11, %v1618_v32  ;;  %v3250_v35 = vpop.eup %3249  ;;  %v1790_v44 = vmul.f32 %v3248_v34, %v3834_v62  ;;  %v1862_v51 = vpop.permute.xlu1 %1861 }
 0x7e9   : > { %2972 = vmatmul.mubr.msk.bf16.vlgmr.msra.gmra.mrb[16].mxu1 %vm1415_vm11, %v1619_v33  ;;  %v1789_v42 = vmul.f32 %v3250_v35, %v3831_v60  ;;  %v1873_v52 = vsel %vm1348_vm8, %v1862_v51, 0 }
 0x7ea   : > { %2984 = vmatpush3.bf16.msra.mxu1 %v1794_v20  ;;  %v1792_v48 = vpack.c.bf16 %v1790_v44, %v1790_v44 }
 0x7eb   : > { %v3252_v40 = vpop.eup %3251  ;;  %3071 = vmatprep.subr.msk.bf16.mxu1 %vm1459_vm9, %v1796_v36 }
 0x7ec   : > { %v1788_v37 = vmul.f32 %v3252_v40, %v3840_v1  ;;  %v1858_v53 = vpop.permute.xlu1 %1857 }
 0x7ee   : > { %2986 = vmatpush3.bf16.msra.mxu1 %v1805_v46  ;;  %v1791_v47 = vpack.c.bf16 %v1789_v42, %v1788_v37 }
 0x7ef   : > { %3072 = vmatprep.subr.msk.bf16.mxu1 %vm1348_vm8, %v1860_v45 }
 0x7f0   : > { %2987 = vmatprep.mubr.msk.bf16.mxu1 %vm1415_vm11, %v1791_v47 }
 0x7f1   : > { %2988 = vmatmul.mubr.msk.bf16.vlgmr.msra.gmra.mrb[20].mxu1 %vm1415_vm11, %v1792_v48  ;;  %v3195_v48 = vld [vmem:[%s3612_s5] sm:$0xff]  }
 0x7f2   : > { %2995 = vmatprep.mubr.msk.bf16.mxu1 %vm1348_vm8, %v1856_v49  ;;  %v3196_v49 = vld [vmem:[%s3612_s5 + $0x8] sm:$0xff]  }
 0x7f7   : > { %2992 = vmatpush3.bf16.xpose.msra.mxu1 %v1870_v50  ;;  %v3197_v50 = vld [vmem:[%s3612_s5 + $0x10] sm:$0xff]  }
 0x7f8   : > { %3073 = vmatprep.subr.msk.bf16.mxu1 %vm1348_vm8, %v1862_v51  ;;  %v3198_v51 = vld [vmem:[%s3612_s5 + $0x18] sm:$0xff]   ;;  %s4142_s5 = sld [smem:[#allocation30_spill]] (!%p2823_p1) }
 0x7ff   : > { %2994 = vmatpush3.bf16.xpose.msra.mxu1 %v1873_v52 }
 0x806   : > { %2996 = vmatmul.mubr.msk.bf16.vlgmr.msra.gmra.mrb[24].mxu1 %vm1348_vm8, %v1858_v53 }
 0x889   : > { %v3877_v38 = vpop.f32.mrb[12].mxu1 }
 0x88a   : > { %v3879_v54 = vpop.f32.mrb[13].mxu1 }
 0x88b   : > { %v2958_v55 = vpop.f32.mrb[14].mxu1 }
 0x88c   : > { %v3881_v56 = vpop.f32.mrb[15].mxu1 }
 0x8bc   : > { %v2973_v57 = vpop.f32.mrb[16].mxu1 }
 0x8bd   : > { %v1670_v58 = vpop.f32.mrb[17].mxu1 }
 0x8be   : > { %v2974_v59 = vpop.f32.mrb[18].mxu1 }
 0x8bf   : > { %v1673_v60 = vpop.f32.mrb[19].mxu1 }
 0x8c0   : > { %v3168_v61 = vpack.i.bf16 %v1673_v60, %v1670_v58 }
 0x8c4   : > { %v2989_v62 = vpop.f32.mrb[20].mxu1 }
 0x8c5   : > { %v1841_v63 = vpop.f32.mrb[21].mxu1 }
 0x8c6   : > { %v2990_v0 = vpop.f32.mrb[22].mxu1 }
 0x8c7   : > { %v1844_v1 = vpop.f32.mrb[23].mxu1 }
 0x8c8   : > { %v3173_v2 = vpack.i.bf16 %v1844_v1, %v1841_v63 }
 0x8d9   : > { %v2997_v3 = vpop.f32.mrb[24].mxu1 }
 0x8da   : > { %v1909_v4 = vpop.f32.mrb[25].mxu1  ;;  %v1925_v5 = vmul.f32 0.25, %v2997_v3 }
 0x8db   : > { %v1923_v6 = vmul.f32 0.25, %v1909_v4  ;;  %v2998_v7 = vpop.f32.mrb[26].mxu1 }
 0x8dc   : > { %v1912_v10 = vpop.f32.mrb[27].mxu1  ;;  %v1928_v15 = vadd.f32 %v1925_v5, %v3784_v39 }
 0x8dd   : > { %v1924_v11 = vmul.f32 0.25, %v1912_v10  ;;  %v1926_v12 = vadd.f32 %v1923_v6, %v3784_v39 }
 0x8de   : > { %v1935_v17 = vsel %vm1415_vm11, %v1928_v15, -inf }
 0x8df   : > { %v1929_v13 = vsel %vm1415_vm11, %v1926_v12, -inf  ;;  %v1927_v8 = vadd.f32 %v1924_v11, %v3784_v39 }
 0x8e0   : > { %1930 = vmax.xlane.f32.xlu0 %v1929_v13 }
 0x8e1   : > { %v1932_v16 = vsel %vm1415_vm11, %v1927_v8, -inf }
 0x8e2   : > { %1933 = vmax.xlane.f32.xlu1 %v1932_v16 }
 0x8e4   : > { %1936 = vmax.xlane.f32.xlu0 %v1935_v17 }
 0x96d   : > { %v1931_v14 = vpop.xlane.xlu0 %1930 }
 0x96e   : > { %v1938_v18 = vsub.f32 %v1926_v12, %v1931_v14 }
 0x96f   : > { %v1934_v19 = vpop.xlane.xlu1 %1933 }
 0x970   : > { %v1941_v20 = vmul.f32 1.442695, %v1938_v18  ;;  %v1939_v21 = vsub.f32 %v1927_v8, %v1934_v19 }
 0x971   : > { %v1937_v22 = vpop.xlane.xlu0 %1936 }
 0x972   : > { %3253 = vpow2.f32 %v1941_v20  ;;  %v1943_v23 = vmul.f32 1.442695, %v1939_v21  ;;  %v1940_v24 = vsub.f32 %v1928_v15, %v1937_v22 }
 0x974   : > { %3255 = vpow2.f32 %v1943_v23  ;;  %v1945_v25 = vmul.f32 1.442695, %v1940_v24  ;;  %v3277_v23 = vld [vmem:[#allocation2] sm:$0xff] }
 0x976   : > { %3257 = vpow2.f32 %v1945_v25 }
 0x97c   : > { %v3254_v39 = vpop.eup %3253 }
 0x97d   : > { %v1947_v26 = vsel %vm1415_vm11, %v3254_v39, 0.0 }
 0x97e   : > { %v3256_v27 = vpop.eup %3255  ;;  %1948 = vadd.xlane.f32.xlu0 %v1947_v26 }
 0x97f   : > { %v1950_v31 = vsel %vm1415_vm11, %v3256_v27, 0.0 }
 0x980   : > { %v3258_v29 = vpop.eup %3257 }
 0x981   : > { %v1953_v30 = vsel %vm1415_vm11, %v3258_v29, 0.0 }
 0x982   : > { %1954 = vadd.xlane.f32.xlu1 %v1953_v30  ;;  %1951 = vadd.xlane.f32.xlu0 %v1950_v31 }
 0x993   : > { %1966 = vrot.lane.b32.xlu1 %v3768_v28, %s3392_s25 }
 0x997   : > { %3169 = vrot.lane.b32.xlu1 %v3168_v61, %s3391_s6 }
 0x998   : > { %1964 = vrot.lane.b32.xlu0 %v3733_v9, %s3392_s25 }
 0x99b   : > { %2033 = vrot.lane.b32.xlu1 %v2973_v57, %s3391_s6 }
 0x99c   : > { %3174 = vrot.lane.b32.xlu0 %v3173_v2, %s3389_s10 }
 0x99f   : > { %2045 = vrot.lane.b32.xlu1 %v2989_v62, %s3389_s10 }
 0xa0b   : > { %v1949_v32 = vpop.xlane.xlu0 %1948 }
 0xa0c   : > { %3259 = vrcp.f32 %v1949_v32 }
 0xa0f   : > { %v1952_v33 = vpop.xlane.xlu0 %1951  ;;  %v1955_v34 = vpop.xlane.xlu1 %1954 }
 0xa10   : > { %3261 = vrcp.f32 %v1952_v33 }
 0xa11   : > { %3263 = vrcp.f32 %v1955_v34 }
 0xa13   : > { %v1965_v35 = vpop.permute.xlu0 %1964  ;;  %v1967_v28 = vpop.permute.xlu1 %1966 }
 0xa14   : > { %2999 = vmatprep.subr.bf16.mxu0 %v1965_v35  ;;  %v1976_v36 = vsel %vm1459_vm9, %v1967_v28, 0 }
 0xa15   : > { %3000 = vmatpush3.bf16.msra.mxu0 %v1965_v35 }
 0xa16   : > { %3074 = vmatprep.subr.msk.bf16.mxu0 %vm1459_vm9, %v1967_v28  ;;  %v3260_v9 = vpop.eup %3259 }
 0xa17   : > { %v1959_v45 = vmul.f32 %v3260_v9, %v3254_v39  ;;  %v3170_v59 = vpop.permute.xlu1 %3169  ;;  %v3175_v61 = vpop.permute.xlu0 %3174  ;;  %v3278_v39 = vld [vmem:[#allocation2 + $0x10] sm:$0xff] }
 0xa18   : > { %v3172_v62 = vunpack.i.h.bf16 %v3170_v59  ;;  %v3171_v63 = vunpack.i.l.bf16 %v3170_v59  ;;  %v3177_v1 = vunpack.i.h.bf16 %v3175_v61  ;;  %v3176_v2 = vunpack.i.l.bf16 %v3175_v61 }
 0xa19   : > { %3002 = vmatpush3.bf16.msra.mxu0 %v1976_v36 }
 0xa1a   : > { %v3262_v40 = vpop.eup %3261  ;;  %3007 = vmatprep.subr.bf16.mxu0 %v3195_v48  ;;  %v2063_v3 = vsel %vm1348_vm8, %v3881_v56, %v3172_v62  ;;  %v2062_v4 = vsel %vm1348_vm8, %v3879_v54, %v3171_v63 }
 0xa1b   : > { %v3264_v44 = vpop.eup %3263  ;;  %v1960_v37 = vmul.f32 %v3262_v40, %v3256_v27  ;;  %v2034_v60 = vpop.permute.xlu1 %2033  ;;  %v2066_v13 = vsel %vm2065_vm12, %v2062_v4, %v3176_v2  ;;  %v2067_v8 = vsel %vm2065_vm12, %v2063_v3, %v3177_v1  ;;  %v3279_v27 = vld [vmem:[#allocation2 + $0x8] sm:$0xff]  ;;  %v2212_v3 = vsub.s32 2, %v3719_v41 }
 0xa1c   : > { %v1961_v42 = vmul.f32 %v3264_v44, %v3258_v29  ;;  %v2064_v6 = vsel %vm1348_vm8, %v3877_v38, %v2034_v60  ;;  %v2800_v38 = vld [vmem:[%s4139_s11] ss:$0 sm:$0xff] }
 0xa1d   : > { %v1962_v46 = vpack.c.bf16 %v1960_v37, %v1959_v45 }
 0xa1e   : > { %v1963_v47 = vpack.c.bf16 %v1961_v42, %v1961_v42 }
 0xa1f   : > { %3003 = vmatprep.mubr.msk.bf16.mxu0 %vm1415_vm11, %v1962_v46  ;;  %v2046_v0 = vpop.permute.xlu1 %2045 }
 0xa20   : > { %3004 = vmatmul.mubr.msk.bf16.vlgmr.msra.gmra.mrb[8].mxu0 %vm1415_vm11, %v1963_v47  ;;  %v2068_v10 = vsel %vm2065_vm12, %v2064_v6, %v2046_v0  ;;  %v2213_v6 = vrot.slane %v3723_v43, %v2212_v3 }
 0xa21   : > { %3008 = vmatpush3.bf16.msra.mxu0 %v3195_v48 }
 0xa22   : > { %3009 = vmatprep.subr.bf16.mxu0 %v3196_v49 }
 0xa25   : > { %3010 = vmatpush3.bf16.msra.mxu0 %v3196_v49 }
 0xa26   : > { %3011 = vmatprep.subr.bf16.mxu0 %v3197_v50 }
 0xa29   : > { %3012 = vmatpush3.bf16.msra.mxu0 %v3197_v50  ;;  %v3199_v50 = vld [vmem:[%s3621_s26] sm:$0xff]  }
 0xa2a   : > { %3013 = vmatprep.subr.bf16.mxu0 %v3198_v51  ;;  %3019 = vmatprep.subr.bf16.mxu1 %v3199_v50 }
 0xa2b   : > { %3020 = vmatpush3.bf16.msra.mxu1 %v3199_v50 }
 0xa2d   : > { %3014 = vmatpush3.bf16.msra.mxu0 %v3198_v51  ;;  %v3200_v51 = vld [vmem:[%s3621_s26 + $0x8] sm:$0xff]  }
 0xa2e   : > { %3021 = vmatprep.subr.bf16.mxu1 %v3200_v51 }
 0xa2f   : > { %3022 = vmatpush3.bf16.msra.mxu1 %v3200_v51 }
 0xaf3   : > { %v3005_v52 = vpop.f32.mrb[8].mxu0 }
 0xaf4   : > { %2057 = vrot.lane.b32.xlu1 %v3005_v52, %s3385_s21  ;;  %v2012_v53 = vpop.f32.mrb[9].mxu0  ;;  %v3201_v52 = vld [vmem:[%s3621_s26 + $0x10] sm:$0xff]  }
 0xaf5   : > { %v3006_v55 = vpop.f32.mrb[10].mxu0  ;;  %3023 = vmatprep.subr.bf16.mxu1 %v3201_v52 }
 0xaf6   : > { %v2015_v57 = vpop.f32.mrb[11].mxu0  ;;  %3024 = vmatpush3.bf16.msra.mxu1 %v3201_v52  ;;  %v3203_v55 = vld [vmem:[%s3630_s12] sm:$0xff]  }
 0xaf7   : > { %v3178_v58 = vpack.i.bf16 %v2015_v57, %v2012_v53  ;;  %v3202_v53 = vld [vmem:[%s3621_s26 + $0x18] sm:$0xff]   ;;  %v3204_v57 = vld [vmem:[%s3630_s12 + $0x8] sm:$0xff]   ;;  %3031 = vmatprep.subr.bf16.mxu0 %v3203_v55 }
 0xaf8   : > { %3025 = vmatprep.subr.bf16.mxu1 %v3202_v53 }
 0xaf9   : > { %3179 = vrot.lane.b32.xlu0 %v3178_v58, %s3385_s21 }
 0xafa   : > { %3026 = vmatpush3.bf16.msra.mxu1 %v3202_v53  ;;  %v2814_v53 = vld [vmem:[%s848_s13] ss:$0 sm:$0xff] }
 0xb66   : > { %v2058_v5 = vpop.permute.xlu1 %2057 }
 0xb67   : > { %v2072_v15 = vsel %vm2069_vm13, %v2068_v10, %v2058_v5 }
 0xb68   : > { %v2074_v14 = vpack.c.bf16 %v2072_v15, %v2072_v15 }
 0xb6b   : > { %v3180_v7 = vpop.permute.xlu0 %3179 }
 0xb6c   : > { %v3182_v11 = vunpack.i.h.bf16 %v3180_v7  ;;  %v3181_v12 = vunpack.i.l.bf16 %v3180_v7  ;;  %v2219_v7 = vsub.s32 3, %v3719_v41  ;;  %v3205_v41 = vld [vmem:[%s3630_s12 + $0x10] sm:$0xff]  }
 0xb6e   : > { %v2070_v16 = vsel %vm2069_vm13, %v2066_v13, %v3181_v12  ;;  %v2071_v17 = vsel %vm2069_vm13, %v2067_v8, %v3182_v11  ;;  %v2220_v15 = vrot.slane %v3723_v43, %v2219_v7  ;;  %v3206_v43 = vld [vmem:[%s3630_s12 + $0x18] sm:$0xff]   ;;  %v3280_v7 = vld [vmem:[%s4140_s1] sm:$0xff] (!%p2823_p1)  }
 0xb6f   : > { %v2073_v56 = vpack.c.bf16 %v2071_v17, %v2070_v16 }
 0xb71   : > { %3015 = vmatprep.mubr.msk.bf16.mxu0 %vm1162_vm7, %v2073_v56 }
 0xb72   : > { %3016 = vmatmul.mubr.msk.bf16.vlgmr.msra.gmra.mrb[12].mxu0 %vm1162_vm7, %v2074_v14 }
 0xb73   : > { %3032 = vmatpush3.bf16.msra.mxu0 %v3203_v55 }
 0xb74   : > { %3033 = vmatprep.subr.bf16.mxu0 %v3204_v57 }
 0xb77   : > { %3034 = vmatpush3.bf16.msra.mxu0 %v3204_v57 }
 0xb78   : > { %3035 = vmatprep.subr.bf16.mxu0 %v3205_v41 }
 0xb7b   : > { %3036 = vmatpush3.bf16.msra.mxu0 %v3205_v41 }
 0xb7c   : > { %3037 = vmatprep.subr.bf16.mxu0 %v3206_v43 }
 0xb7f   : > { %3038 = vmatpush3.bf16.msra.mxu0 %v3206_v43 }
 0xc45   : > { %v3017_v54 = vpop.f32.mrb[12].mxu0 }
 0xc46   : > { %v2154_v18 = vpop.f32.mrb[13].mxu0  ;;  %v2163_v19 = vadd.f32 %v3017_v54, %v2800_v38 }
 0xc47   : > { %v2155_v20 = vadd.f32 %v2800_v38, %v2154_v18  ;;  %v3018_v21 = vpop.f32.mrb[14].mxu0 }
 0xc48   : > { %v2157_v22 = vpop.f32.mrb[15].mxu0  ;;  %v3925_v26 = vadd.f32 %v3278_v39, %v2163_v19  ;;  %v3207_v19 = vld [vmem:[%s3630_s12 + $0x20] sm:$0xff]   ;;  %v3209_v21 = vld [vmem:[%s3630_s12 + $0x30] sm:$0xff]  }
 0xc49   : > { %v3923_v24 = vadd.f32 %v3277_v23, %v2155_v20  ;;  %v2158_v25 = vadd.f32 %v2800_v38, %v2157_v22  ;;  %3039 = vmatprep.subr.bf16.mxu0 %v3207_v19  ;;  %v3208_v20 = vld [vmem:[%s3630_s12 + $0x28] sm:$0xff]   ;;  %v3210_v22 = vld [vmem:[%s3630_s12 + $0x38] sm:$0xff]   ;;  %v2807_v23 = vld [vmem:[%s840_s7] ss:$0 sm:$0xff]  ;;  %s4143_s12 = sld [smem:[#allocation32_spill]] (!%p2823_p1) }
 0xc4a   : > { %v2177_v32 = vsel %vm1162_vm7, %v3925_v26, 0.0  ;;  %3040 = vmatpush3.bf16.msra.mxu0 %v3207_v19 }
 0xc4b   : > { %v3927_v29 = vadd.f32 %v3279_v27, %v2158_v25  ;;  %v2171_v30 = vsel %vm1162_vm7, %v3923_v24, 0.0  ;;  %3041 = vmatprep.subr.bf16.mxu0 %v3208_v20 }
 0xc4c   : > { %2172 = vadd.xlane.f32.xlu0 %v2171_v30 }
 0xc4d   : > { %v2174_v31 = vsel %vm1162_vm7, %v3927_v29, 0.0 }
 0xc4e   : > { %2175 = vadd.xlane.f32.xlu1 %v2174_v31  ;;  %3042 = vmatpush3.bf16.msra.mxu0 %v3208_v20 }
 0xc4f   : > { %3043 = vmatprep.subr.bf16.mxu0 %v3209_v21  ;;  %v2493_v41 = vld [vmem:[%s4143_s12] sm:$0x1] (!%p2823_p1) }
 0xc50   : > { %2178 = vadd.xlane.f32.xlu0 %v2177_v32 }
 0xc52   : > { %3044 = vmatpush3.bf16.msra.mxu0 %v3209_v21 }
 0xc53   : > { %3045 = vmatprep.subr.bf16.mxu0 %v3210_v22 }
 0xc56   : > { %3046 = vmatpush3.bf16.msra.mxu0 %v3210_v22 }
 0xcd9   : > { %v2173_v33 = vpop.xlane.xlu0 %2172 }
 0xcda   : > { %v2180_v34 = vmul.f32 0.015625, %v2173_v33 }
 0xcdb   : > { %v2176_v35 = vpop.xlane.xlu1 %2175 }
 0xcdc   : > { %v2183_v28 = vsub.f32 %v3923_v24, %v2180_v34  ;;  %v2181_v9 = vmul.f32 0.015625, %v2176_v35 }
 0xcdd   : > { %v2179_v36 = vpop.xlane.xlu0 %2178 }
 0xcde   : > { %v2184_v40 = vsub.f32 %v3927_v29, %v2181_v9  ;;  %v2182_v44 = vmul.f32 0.015625, %v2179_v36  ;;  %v2186_v45 = vmul.f32 %v2183_v28, %v2183_v28 }
 0xce0   : > { %v2185_v37 = vsub.f32 %v3925_v26, %v2182_v44  ;;  %v2189_v42 = vsel %vm1162_vm7, %v2186_v45, 0.0  ;;  %v2187_v46 = vmul.f32 %v2184_v40, %v2184_v40 }
 0xce1   : > { %2190 = vadd.xlane.f32.xlu0 %v2189_v42 }
 0xce2   : > { %v2188_v47 = vmul.f32 %v2185_v37, %v2185_v37  ;;  %v2192_v48 = vsel %vm1162_vm7, %v2187_v46, 0.0 }
 0xce4   : > { %v2195_v49 = vsel %vm1162_vm7, %v2188_v47, 0.0 }
 0xce5   : > { %2193 = vadd.xlane.f32.xlu0 %v2192_v48  ;;  %2196 = vadd.xlane.f32.xlu1 %v2195_v49 }
 0xd6e   : > { %v2191_v58 = vpop.xlane.xlu0 %2190 }
 0xd6f   : > { %v2198_v59 = vmul.f32 0.015625, %v2191_v58 }
 0xd71   : > { %v2201_v60 = vadd.f32 1e-06, %v2198_v59 }
 0xd72   : > { %v2197_v61 = vpop.xlane.xlu1 %2196  ;;  %v2194_v62 = vpop.xlane.xlu0 %2193 }
 0xd73   : > { %3265 = vrsqrt.f32 %v2201_v60  ;;  %v2200_v63 = vmul.f32 0.015625, %v2197_v61  ;;  %v2199_v0 = vmul.f32 0.015625, %v2194_v62 }
 0xd75   : > { %v2203_v1 = vadd.f32 1e-06, %v2200_v63  ;;  %v2202_v2 = vadd.f32 1e-06, %v2199_v0 }
 0xd77   : > { %3267 = vrsqrt.f32 %v2203_v1 }
 0xd78   : > { %3269 = vrsqrt.f32 %v2202_v2 }
 0xd7d   : > { %v3266_v4 = vpop.eup %3265 }
 0xd7e   : > { %v2207_v5 = vmul.f32 %v3266_v4, %v2183_v28 }
 0xd80   : > { %v2214_v8 = vmul.f32 %v2213_v6, %v2207_v5 }
 0xd81   : > { %v3268_v10 = vpop.eup %3267 }
 0xd82   : > { %v3270_v11 = vpop.eup %3269  ;;  %v2209_v12 = vmul.f32 %v3268_v10, %v2185_v37  ;;  %v2221_v14 = vadd.f32 %v2220_v15, %v2214_v8  ;;  %v3281_v10 = vld [vmem:[%s4141_s20 + $0x8] sm:$0xff] (!%p2823_p1)  }
 0xd83   : > { %v2208_v13 = vmul.f32 %v3270_v11, %v2184_v40  ;;  %v3282_v11 = vld [vmem:[%s4141_s20 + $0x10] sm:$0xff] (!%p2823_p1)  }
 0xd84   : > { %v2216_v16 = vmul.f32 %v2213_v6, %v2209_v12  ;;  %v3283_v12 = vld [vmem:[%s4141_s20 + $0x18] sm:$0xff] (!%p2823_p1)  }
 0xd85   : > { %v2215_v17 = vmul.f32 %v2213_v6, %v2208_v13 }
 0xd86   : > { %v2223_v56 = vadd.f32 %v2220_v15, %v2216_v16 }
 0xd87   : > { %v2222_v38 = vadd.f32 %v2220_v15, %v2215_v17  ;;  %v2466_v17 = vld [vmem:[%s4142_s5] sm:$0x1] (!%p2823_p1) }
 0xd88   : > { %v2225_v54 = vpack.c.bf16 %v2223_v56, %v2223_v56 }
 0xd89   : > { %v2224_v18 = vpack.c.bf16 %v2222_v38, %v2221_v14  ;;  %v2467_v14 = vld [vmem:[%s4142_s5 + $0x1] sm:$0x1] (!%p2823_p1) }
 0xd8b   : > { %3027 = vmatprep.mubr.msk.bf16.mxu1 %vm1162_vm7, %v2224_v18 }
 0xd8c   : > { %3028 = vmatmul.mubr.msk.bf16.vlgmr.msra.gmra.mrb[28].mxu1 %vm1162_vm7, %v2225_v54 }
 0xe5f   : > { %v3029_v25 = vpop.f32.mrb[28].mxu1 }
 0xe60   : > { %v2314_v39 = vadd.f32 %v3029_v25, %v2807_v23  ;;  %v2305_v27 = vpop.f32.mrb[29].mxu1 }
 0xe61   : > { %v2306_v30 = vadd.f32 %v2807_v23, %v2305_v27  ;;  %v3030_v31 = vpop.f32.mrb[30].mxu1 }
 0xe62   : > { %v2324_v32 = vmul.f32 0.70710677, %v2314_v39  ;;  %v2308_v33 = vpop.f32.mrb[31].mxu1  ;;  %v2321_v37 = vmul.f32 0.5, %v2314_v39 }
 0xe63   : > { %v2322_v34 = vmul.f32 0.70710677, %v2306_v30  ;;  %v2309_v35 = vadd.f32 %v2807_v23, %v2308_v33  ;;  %v2319_v42 = vmul.f32 0.5, %v2306_v30 }
 0xe64   : > { %3271 = verf.f32 %v2324_v32 }
 0xe65   : > { %3273 = verf.f32 %v2322_v34  ;;  %v2323_v28 = vmul.f32 0.70710677, %v2309_v35  ;;  %v2320_v46 = vmul.f32 0.5, %v2309_v35 }
 0xe67   : > { %3275 = verf.f32 %v2323_v28 }
 0xe6e   : > { %v3272_v9 = vpop.eup %3271 }
 0xe6f   : > { %v3274_v36 = vpop.eup %3273  ;;  %v2330_v40 = vadd.f32 1.0, %v3272_v9 }
 0xe70   : > { %v2328_v44 = vadd.f32 1.0, %v3274_v36 }
 0xe71   : > { %v3276_v45 = vpop.eup %3275  ;;  %v2333_v48 = vmul.f32 %v2330_v40, %v2321_v37 }
 0xe72   : > { %v2329_v47 = vadd.f32 1.0, %v3276_v45  ;;  %v2331_v49 = vmul.f32 %v2328_v44, %v2319_v42 }
 0xe73   : > { %v2335_v52 = vpack.c.bf16 %v2333_v48, %v2333_v48 }
 0xe74   : > { %v2332_v50 = vmul.f32 %v2329_v47, %v2320_v46 }
 0xe76   : > { %v2334_v51 = vpack.c.bf16 %v2332_v50, %v2331_v49 }
 0xe78   : > { %3047 = vmatprep.mubr.bf16.mxu0 %v2334_v51 }
 0xe79   : > { %3048 = vmatmul.mubr.bf16.vlgmr.msra.gmra.mrb[16].mxu0 %v2335_v52 }
 0xf4c   : > { %v3049_v55 = vpop.f32.mrb[16].mxu0 }
 0xf4d   : > { %v2450_v57 = vadd.f32 %v3049_v55, %v2814_v53  ;;  %v2441_v58 = vpop.f32.mrb[17].mxu0 }
 0xf4e   : > { %v2442_v59 = vadd.f32 %v2814_v53, %v2441_v58  ;;  %v3050_v60 = vpop.f32.mrb[18].mxu0  ;;  %2464 = sbr.rel (%p2823_p1) target bundleno = 4460 (0x116c), region = 116 }
 0xf4f   : > { %v2457_v61 = vadd.f32 %v2450_v57, %v3925_v26  ;;  %v2444_v62 = vpop.f32.mrb[19].mxu0 }
 0xf50   : > { %v2455_v63 = vadd.f32 %v2442_v59, %v3923_v24  ;;  %v2445_v0 = vadd.f32 %v2814_v53, %v2444_v62 }
 0xf51   : > { %2460 = vst.msk [vmem:[#allocation2 + $0x10] sm:$0xff] %vm1162_vm7, %v2457_v61 }
 0xf52   : > { %2458 = vst.msk [vmem:[#allocation2] sm:$0xff] %vm1162_vm7, %v2455_v63  ;;  %v2456_v1 = vadd.f32 %v2445_v0, %v3927_v29  ;;  %v3393_v29 = vmov (!%p2823_p1), 0.0  }
 0xf53   : > { %3051 = vmatprep.subr.bf16.mxu0 (!%p2823_p1), %v3393_v29  ;;  %3059 = vmatprep.mubr.msk.bf16.mxu0 (!%p2823_p1), %vm3394_vm15, %v3393_v29 }
 0xf54   : > { %2459 = vst.msk [vmem:[#allocation2 + $0x8] sm:$0xff] %vm1162_vm7, %v2456_v1  ;;  %3052 = vmatpush3.bf16.msra.mxu0 (!%p2823_p1), %v3280_v7 }
 0xf55   : > { %3053 = vmatprep.subr.bf16.mxu0 %v3393_v29 }
 0xf58   : > { %3054 = vmatpush3.bf16.msra.mxu0 %v3281_v10 }
 0xf59   : > { %v2465_v2 = vld [vmem:[#allocation2] sm:$0x1]  ;;  %3055 = vmatprep.subr.bf16.mxu0 %v3393_v29 }
 0xf5a   : > { %v2469_v3 = vsel %vm2468_vm14, %v2465_v2, 0.0 }
 0xf5b   : > { %2470 = vadd.xlane.f32.xlu0 %v2469_v3 }
 0xf5c   : > { %3056 = vmatpush3.bf16.msra.mxu0 %v3282_v11 }
 0xf5d   : > { %3057 = vmatprep.subr.bf16.mxu0 %v3393_v29 }
 0xf60   : > { %3058 = vmatpush3.bf16.msra.mxu0 %v3283_v12 }
 0xfe8   : > { %v2471_v26 = vpop.xlane.xlu0 %2470 }
 0xfe9   : > { %v2472_v4 = vmul.f32 0.015625, %v2471_v26 }
 0xfeb   : > { %v2473_v5 = vsub.f32 %v2465_v2, %v2472_v4 }
 0xfed   : > { %v2474_v24 = vmul.f32 %v2473_v5, %v2473_v5 }
 0xfef   : > { %v2475_v6 = vsel %vm2468_vm14, %v2474_v24, 0.0 }
 0xff0   : > { %2476 = vadd.xlane.f32.xlu0 %v2475_v6 }
0x107d   : > { %v2477_v13 = vpop.xlane.xlu0 %2476 }
0x107e   : > { %v2478_v8 = vmul.f32 0.015625, %v2477_v13 }
0x1080   : > { %v2479_v15 = vadd.f32 1e-06, %v2478_v8 }
0x1082   : > { %3284 = vrsqrt.f32 %v2479_v15 }
0x108c   : > { %v3285_v16 = vpop.eup %3284 }
0x108d   : > { %v2481_v56 = vmul.f32 %v3285_v16, %v2473_v5 }
0x108f   : > { %v2482_v38 = vmul.f32 %v2481_v56, %v2466_v17 }
0x1091   : > { %v2483_v54 = vadd.f32 %v2482_v38, %v2467_v14 }
0x1093   : > { %v2484_v18 = vpack.c.bf16 %v2483_v54, %v2483_v54 }
0x1095   : > { %3060 = vmatmul.mubr.msk.bf16.vlgmr.msra.gmra.mrb[0].mxu0 %vm1162_vm7, %v2484_v18 }
0x1168   : > { %v2555_v43 = vpop.f32.mrb[0].mxu0 }
0x1169   : > { %v2556_v19 = vadd.f32 %v2555_v43, %v2493_v41  ;;  %v3061_v20 = vpop.f32.mrb[1].mxu0 }
0x116a   : > { %v2558_v21 = vpop.f32.mrb[2].mxu0 }
0x116b   : > { %2562 = vst.msk [vmem:[%s3638_s2] sm:$0x1] %vm2561_vm0, %v2556_v19  ;;  %v3062_v22 = vpop.f32.mrb[3].mxu0 }
0x116c PF: > { %s4144_s7 = sld [smem:[#allocation8_spill]]  ;;  %s2576_s23 = sshll.u32 %s3638_s2, 4  ;;  %s2577_s23 = int_to_ptr.vmem [resolvable:$true] %s2576_s23 }
0x116d   : > { %s4146_s21 = sld [smem:[#allocation33_spill]]  ;;  %s4147_s29 = sand.u32 1, %s3356_s28  }
0x116e   : > { %s2564_s10 = scalar_lea.sflag [#allocation4], %s4147_s29  ;;  %s3286_s6 = scalar_lea.vmem %s2577_s23, 16 }
0x116f   : > { %p3287_p2 = scmp.ne.s32.totalorder %s2577_s23, %s3286_s6  ;;  %s3395_s25 = smov [#allocation3]  }
0x1170   : > { %s3290_s4 = sshll.u32 %s3395_s25, 4  ;;  %s3291_s4 = int_to_ptr.vmem [resolvable:$false] %s3290_s4 }
0x1171   : > { %p3288_p4 = pnand %p3287_p2, %p3560_p3  ;;  %s3292_s11 = scalar_lea.vmem %s3291_s4, 32 }
0x1172   : > { %s2829_s3 = sshll.u32 %s4144_s7, 4  ;;  %p3293_p6 = scmp.lt.s32.totalorder %s2577_s23, %s3291_s4 }
0x1173   : > { %s4003_s0 = scalar_lea.hbm %s4146_s21, %s2829_s3  ;;  %p3289_p5 = pneg %p3288_p4 }
0x1174   : > { %p3294_p7 = scmp.lt.s32.totalorder %s3292_s11, %s3286_s6 }
0x1176   : > { %p3295_p8 = por %p3294_p7, %p3293_p6 }
0x1178   : > { %p3296_p10 = pnand %p3295_p8, %p3289_p5 }
0x117a   : > { %3299 = shalt.err (!%p3296_p10)
}
0x117b   : > { %s3300_s2 = scalar_lea.hbm %s4003_s0, 16  ;;  %s3304_s12 = scalar_lea.hbm %s4146_s21, 32 }
0x117c   : > { %p3301_p11 = scmp.ne.s32.totalorder %s4003_s0, %s3300_s2  ;;  %p3305_p0 = scmp.lt.u32.totalorder %s4003_s0, %s4146_s21 }
0x117d   : > { %p3306_p1 = scmp.lt.u32.totalorder %s3304_s12, %s3300_s2  ;;  %p3308_p4 = scmp.lt.u32.totalorder %s3300_s2, %s4003_s0 }
0x117e   : > { %p3302_p12 = pnand %p3301_p11, %p3560_p3 }
0x117f   : > { %p3307_p2 = por %p3306_p1, %p3305_p0 }
0x1180   : > { %p3303_p13 = pneg %p3302_p12 }
0x1181   : > { %p3309_p5 = por %p3308_p4, %p3307_p2 }
0x1183   : > { %p3310_p6 = pnand %p3309_p5, %p3303_p13 }
0x1185   : > { %3313 = shalt.err (!%p3310_p6)
}
0x1186   : > { %3075 = dma.vmem_to_hbm [thread:$0]  (%p3560_p3), %s2577_s23, 16, %s4003_s0, %s2564_s10  }
0x1187 PF: > { %s4148_s1 = sld [smem:[#allocation11_spill]]  ;;  %s4149_s30 = sld [smem:[#allocation6_spill]] }
0x118d   : > { %p3081_p7 = scmp.ge.s32.totalorder %s4148_s1, 2  ;;  %s2588_s6 = sand.u32 1, %s4149_s30  }
0x118e   : > { %s2589_s25 = scalar_lea.sflag [#allocation4], %s2588_s6 }
0x118f   : > { %p3078_p8 = pnand %p3081_p7, %p3570_p9 }
0x1191   : > { %3347 = dma.done.wait (!%p3078_p8), %s2589_s25, 16  }
0x1192   : > { %3349 = vsyncadd (!%p3078_p8), %s2589_s25, 4294967280  ;;  %s35_s1 = sadd.s32 1, %s4148_s1   ;;  %s4151_s4 = sld [smem:[#allocation7_spill]] }
0x1193   : > { %p32_p10 = scmp.ge.s32.totalorder %s35_s1, 6   ;;  %s4152_s29 = sld [smem:[#allocation16_spill]] }
0x1194   : > { %s4153_s30 = sld [smem:[#allocation9_spill]]  ;;  %s4154_s13 = sld [smem:[#allocation10_spill]] }
0x1195   : > { %s4155_s0 = sld [smem:[#allocation12_spill]]  ;;  %s4156_s23 = sld [smem:[#allocation14_spill]] }
0x1196   : > { %s4157_s3 = smov %s3356_s28  ;;  %34 = sbr.rel (!%p32_p10) target bundleno = 22 (0x16), region = 178 }
0x1198   : > { %s4158_s28 = smov %s4151_s4 }
0x119a   : > { %s4159_s4 = smov %s4154_s13 }
0x119d   :  { %2593 = vsyncpa [#allocation4], 1 }
0x119e   :  { %2595 = vsyncpa [#allocation4 + $0x1], 1 }

</bundles_post_ra>
